<compile_context>
chip_gen: v6e
topology: v6e:2x2x1
jax: 0.10.0
libtpu: 0.0.40
codegen_flags: <defaults>
</compile_context>

<pallas_src>
import jax
import jax.numpy as jnp
from jax import lax
from jax.experimental import pallas as pl
from jax.experimental.pallas import tpu as pltpu


def _nbc_pallas(xpf, w_all, b_all, mask_q, *, H, W, single_buffer_consts):
    """Fused NBC stack.  xpf: (N, C, T) zero-padded, flattened, prefixed input."""
    N, C, T = xpf.shape
    L = w_all.shape[0]
    Wp = W + 2                       # padded row length
    Q = H * Wp                       # flat output domain (2 junk cols per row)
    OFF = Wp + 1                     # flat offset of interior pixel (1, 1)
    PRE = (-OFF) % 128               # zero prefix -> interior store lane-aligned
    ORG = PRE + OFF                  # interior origin inside the VMEM buffer

    def kernel(x_ref, w_ref, b_ref, m_ref, out_ref, pad_ref):
        mask = m_ref[...]                               # (1, Q) f32, hoisted
        # Padded running activation; borders already zero (wrapper pads once
        # per forward).  Interior-only rewrites below keep the borders zero.
        pad_ref[...] = x_ref[0].astype(jnp.float32)     # (C, T)

        def conv3x3_relu(w_l, s, bias):
            # acc[co, q] = sum_k sum_ci w[k, co, ci] * pad[ci, q + dy*Wp + dx]
            # 9 accumulating tap matmuls, bf16 inputs, f32 accumulation.
            acc = jnp.zeros((C, Q), jnp.float32)
            for k in range(9):                          # static unroll
                dy, dx = divmod(k, 3)
                d = PRE + dy * Wp + dx
                tap = pad_ref[:, d:d + Q].astype(jnp.bfloat16)      # (C, Q)
                acc = acc + jnp.dot(w_l[9 * s + k], tap,
                                    preferred_element_type=jnp.float32)
            return jnp.maximum(acc + bias, 0.0)         # f32 bias + ReLU

        def layer(l, carry):
            w_l = w_ref[l]                              # (18, C, C) bf16
            b_l = b_ref[l]                              # (2, C, 1)  f32
            resid = pad_ref[:, ORG:ORG + Q]             # block input (f32)
            a1 = conv3x3_relu(w_l, 0, b_l[0])
            # Masked slab store: junk columns write zeros onto the border,
            # preserving the implicit zero padding for the next conv.
            pad_ref[:, ORG:ORG + Q] = a1 * mask
            a2 = conv3x3_relu(w_l, 1, b_l[1])
            pad_ref[:, ORG:ORG + Q] = (resid + a2) * mask   # residual, f32
            return carry

        lax.fori_loop(0, L, layer, 0)
        out_ref[0] = pad_ref[:, ORG:ORG + Q].astype(out_ref.dtype)

    const_kw = dict(pipeline_mode=pl.Buffered(1)) if single_buffer_consts else {}

    # Per-step VMEM estimate (bytes): double-buffered x/out blocks, single
    # buffered constants, f32 scratch.  Generous headroom, capped for v7x.
    est = (2 * C * T * 4 + 2 * C * Q * 4 + L * 18 * C * C * 2
           + L * 2 * C * 4 + Q * 4 + C * T * 4)
    vmem_limit = int(max(8 * 2 ** 20, min(48 * 2 ** 20, 4 * est)))

    return pl.pallas_call(
        kernel,
        out_shape=jax.ShapeDtypeStruct((N, C, Q), xpf.dtype),
        grid_spec=pltpu.PrefetchScalarGridSpec(
            num_scalar_prefetch=0,
            grid=(N,),
            in_specs=[
                pl.BlockSpec((1, C, T), lambda n: (n, 0, 0)),
                pl.BlockSpec((L, 18, C, C), lambda n: (0, 0, 0, 0), **const_kw),
                pl.BlockSpec((L, 2, C, 1), lambda n: (0, 0, 0, 0), **const_kw),
                pl.BlockSpec((1, Q), lambda n: (0, 0), **const_kw),
            ],
            out_specs=pl.BlockSpec((1, C, Q), lambda n: (n, 0, 0)),
            scratch_shapes=[pltpu.VMEM((C, T), jnp.float32)],
        ),
        compiler_params=pltpu.CompilerParams(
            dimension_semantics=("parallel",),
            vmem_limit_bytes=vmem_limit,
        ),
    )(xpf, w_all, b_all, mask_q)


def build_nbc_forward(single_buffer_consts=True):
    @jax.jit
    def nbc_forward_nchw(x_nchw, w_all, b_all):
        """NBC forward; x: (N, C, H, W) like the PyTorch module, returns NCHW."""
        N, C, H, W = x_nchw.shape
        Wp = W + 2
        Q = H * Wp
        PRE = (-(Wp + 1)) % 128
        # One zero-pad per forward: 1px halo, one extra zero bottom row so every
        # shifted tap slice stays in-bounds, and PRE leading zeros so the
        # kernel's interior slab store starts lane-aligned.
        xp = jnp.pad(x_nchw, ((0, 0), (0, 0), (1, 2), (1, 1)))
        xpf = jnp.pad(xp.reshape(N, C, (H + 3) * Wp), ((0, 0), (0, 0), (PRE, 0)))
        # 1.0 on real output columns, 0.0 on the 2 junk columns of each row.
        mask_q = (jnp.arange(Q, dtype=jnp.int32) % Wp < W)
        mask_q = mask_q.astype(jnp.float32)[None, :]
        y = _nbc_pallas(xpf, w_all, b_all, mask_q, H=H, W=W,
                        single_buffer_consts=single_buffer_consts)
        return y.reshape(N, C, H, Wp)[:, :, :, :W]
    return nbc_forward_nchw


# ---------------- parameter helpers (PyTorch layout <-> kernel layout) --------

def init_nbc_params(key, in_channels, num_of_layers):
    """Torch-Conv2d-style deterministic init: w (Cout,Cin,3,3), b (C,)."""
    params = []
    c = in_channels
    bound = (1.0 / (c * 9)) ** 0.5
    for _ in range(num_of_layers):
        key, k1, k2, k3, k4 = jax.random.split(key, 5)
        w1 = jax.random.uniform(k1, (c, c, 3, 3), jnp.float32, -bound, bound)
        b1 = jax.random.uniform(k2, (c,), jnp.float32, -bound, bound)
        w2 = jax.random.uniform(k3, (c, c, 3, 3), jnp.float32, -bound, bound)
        b2 = jax.random.uniform(k4, (c,), jnp.float32, -bound, bound)
        params.append((w1, b1, w2, b2))
    return params


def pack_nbc_params(params):
    """Stack torch-layout params into kernel operands.

    w_all: (L, 18, C, C) bf16 with w_all[l, 9*s + 3*dy + dx, c_out, c_in]
    b_all: (L, 2, C, 1)  f32
    """
    def to_taps(w):                      # (Cout, Cin, 3, 3) -> (9, Cout, Cin)
        c_out, c_in = w.shape[0], w.shape[1]
        return jnp.transpose(w, (2, 3, 0, 1)).reshape(9, c_out, c_in)

    w_layers, b_layers = [], []
    for (w1, b1, w2, b2) in params:
        w_layers.append(jnp.concatenate([to_taps(w1), to_taps(w2)], axis=0))
        b_layers.append(jnp.stack([b1[:, None], b2[:, None]]))
    return (jnp.stack(w_layers).astype(jnp.bfloat16),
            jnp.stack(b_layers).astype(jnp.float32))


# ---------------- pure-JAX reference (same precision policy) ------------------

def _reference_forward(x_nchw, params):
    """lax.conv reference mirroring the kernel's numerics: bf16 conv inputs and
    weights, f32 accumulation, f32 bias / ReLU / residual chain."""
    dn = ("NCHW", "OIHW", "NCHW")
    cur = x_nchw.astype(jnp.float32)
    for (w1, b1, w2, b2) in params:
        h = lax.conv_general_dilated(cur.astype(jnp.bfloat16),
                                     w1.astype(jnp.bfloat16),
                                     (1, 1), "SAME", dimension_numbers=dn,
                                     preferred_element_type=jnp.float32)
        h = jnp.maximum(h + b1.reshape(1, -1, 1, 1), 0.0)
        h = lax.conv_general_dilated(h.astype(jnp.bfloat16),
                                     w2.astype(jnp.bfloat16),
                                     (1, 1), "SAME", dimension_numbers=dn,
                                     preferred_element_type=jnp.float32)
        h = jnp.maximum(h + b2.reshape(1, -1, 1, 1), 0.0)
        cur = cur + h
    return cur


if __name__ == "__main__":
    in_channels = 4
    num_of_layers = 2
    N, H, W = 2, 16, 16

    key = jax.random.PRNGKey(0)
    key, kx = jax.random.split(key)
    x = jax.random.normal(kx, (N, in_channels, H, W), jnp.float32)  # NCHW input
    params = init_nbc_params(key, in_channels, num_of_layers)
    w_all, b_all = pack_nbc_params(params)

    fwd = build_nbc_forward(single_buffer_consts=True)
    try:
        out = jax.block_until_ready(fwd(x, w_all, b_all))
    except Exception:
        # pipeline_mode=pl.Buffered(1) unavailable on this build; identical
        # numerics with default double buffering.
        fwd = build_nbc_forward(single_buffer_consts=False)
        out = jax.block_until_ready(fwd(x, w_all, b_all))

    ref = _reference_forward(x, params)
    assert out.shape == (N, in_channels, H, W)
    assert jnp.allclose(out, ref, atol=1e-3, rtol=1e-3), (
        f"mismatch vs reference (max abs err {jnp.max(jnp.abs(out - ref))})")

    print("KERNEL_OK")
</pallas_src>

<mosaic_0001>
module attributes {stable_mosaic.version = 11 : i64} {
  func.func @kernel(%arg0: i32, %arg1: memref<1x4x451xf32, #tpu.memory_space<vmem>>, %arg2: memref<2x18x4x4xbf16, #tpu.memory_space<vmem>>, %arg3: memref<2x2x4x1xf32, #tpu.memory_space<vmem>>, %arg4: memref<1x288xf32, #tpu.memory_space<vmem>>, %arg5: memref<1x4x288xf32, #tpu.memory_space<vmem>>, %arg6: memref<4x451xf32, #tpu.memory_space<vmem>>) attributes {dimension_semantics = [#tpu.dimension_semantics<parallel>], iteration_bounds = array<i64: 2>, scalar_prefetch = 0 : i64, scratch_operands = 1 : i64, tpu.core_type = #tpu.core_type<tc>, window_params = [{transform_indices = @transform_0, window_bounds = array<i64: 1, 4, 451>}, {pipeline_mode = #tpu.pipeline_mode<synchronous>, transform_indices = @transform_1, window_bounds = array<i64: 2, 18, 4, 4>}, {pipeline_mode = #tpu.pipeline_mode<synchronous>, transform_indices = @transform_2, window_bounds = array<i64: 2, 2, 4, 1>}, {pipeline_mode = #tpu.pipeline_mode<synchronous>, transform_indices = @transform_3, window_bounds = array<i64: 1, 288>}, {transform_indices = @transform_4, window_bounds = array<i64: 1, 4, 288>}]} {
    %c0 = arith.constant 0 : index
    %c0_0 = arith.constant 0 : index
    %0 = vector.load %arg4[%c0, %c0_0] : memref<1x288xf32, #tpu.memory_space<vmem>>, vector<1x288xf32>
    %c0_1 = arith.constant 0 : index
    %c0_2 = arith.constant 0 : index
    %c0_3 = arith.constant 0 : index
    %1 = vector.load %arg1[%c0_1, %c0_2, %c0_3] : memref<1x4x451xf32, #tpu.memory_space<vmem>>, vector<1x4x451xf32>
    %2 = vector.shape_cast %1 : vector<1x4x451xf32> to vector<4x451xf32>
    %c0_4 = arith.constant 0 : index
    %c0_5 = arith.constant 0 : index
    %3 = vector.load %arg6[%c0_4, %c0_5] : memref<4x451xf32, #tpu.memory_space<vmem>>, vector<4x451xf32>
    tpu.vector_store %arg6[%c0_4, %c0_5], %2 {strides = array<i32>} : memref<4x451xf32, #tpu.memory_space<vmem>>, vector<4x451xf32>,
    %c0_i32 = arith.constant 0 : i32
    %c2_i32 = arith.constant 2 : i32
    %4 = arith.addi %c0_i32, %c2_i32 : i32
    %c1_i32 = arith.constant 1 : i32
    scf.for %arg7 = %c0_i32 to %4 step %c1_i32  : i32 {
      %9 = arith.index_cast %arg7 : i32 to index
      %c0_11 = arith.constant 0 : index
      %c0_12 = arith.constant 0 : index
      %c0_13 = arith.constant 0 : index
      %10 = vector.load %arg2[%9, %c0_11, %c0_12, %c0_13] : memref<2x18x4x4xbf16, #tpu.memory_space<vmem>>, vector<1x18x4x4xbf16>
      %11 = vector.shape_cast %10 : vector<1x18x4x4xbf16> to vector<18x4x4xbf16>
      %12 = arith.index_cast %arg7 : i32 to index
      %c0_14 = arith.constant 0 : index
      %c0_15 = arith.constant 0 : index
      %c0_16 = arith.constant 0 : index
      %13 = vector.load %arg3[%12, %c0_14, %c0_15, %c0_16] : memref<2x2x4x1xf32, #tpu.memory_space<vmem>>, vector<1x2x4x1xf32>
      %14 = vector.shape_cast %13 : vector<1x2x4x1xf32> to vector<2x4x1xf32>
      %c0_17 = arith.constant 0 : index
      %c128_18 = arith.constant 128 : index
      %15 = vector.load %arg6[%c0_17, %c128_18] : memref<4x451xf32, #tpu.memory_space<vmem>>, vector<4x288xf32>
      %16 = vector.extract_strided_slice %14 {offsets = [0, 0, 0], sizes = [1, 4, 1], strides = [1, 1, 1]} : vector<2x4x1xf32> to vector<1x4x1xf32>
      %17 = vector.shape_cast %16 : vector<1x4x1xf32> to vector<4x1xf32>
      %cst = arith.constant 0.000000e+00 : f32
      %18 = vector.broadcast %cst : f32 to vector<4x288xf32>
      %c0_19 = arith.constant 0 : index
      %c109 = arith.constant 109 : index
      %19 = vector.load %arg6[%c0_19, %c109] : memref<4x451xf32, #tpu.memory_space<vmem>>, vector<4x288xf32>
      %20 = arith.truncf %19 : vector<4x288xf32> to vector<4x288xbf16>
      %21 = vector.extract_strided_slice %11 {offsets = [0, 0, 0], sizes = [1, 4, 4], strides = [1, 1, 1]} : vector<18x4x4xbf16> to vector<1x4x4xbf16>
      %22 = vector.shape_cast %21 : vector<1x4x4xbf16> to vector<4x4xbf16>
      %cst_20 = arith.constant dense<0.000000e+00> : vector<4x288xf32>
      %23 = tpu.matmul %22, %20, %cst_20 {dimension_numbers = #tpu.dot_dimension_numbers<[1], [0], [0], [1], [0, 0, 1, 1], [], []>} : vector<4x4xbf16>, vector<4x288xbf16>, vector<4x288xf32> -> vector<4x288xf32>
      %24 = arith.addf %18, %23 : vector<4x288xf32>
      %c0_21 = arith.constant 0 : index
      %c110 = arith.constant 110 : index
      %25 = vector.load %arg6[%c0_21, %c110] : memref<4x451xf32, #tpu.memory_space<vmem>>, vector<4x288xf32>
      %26 = arith.truncf %25 : vector<4x288xf32> to vector<4x288xbf16>
      %27 = vector.extract_strided_slice %11 {offsets = [1, 0, 0], sizes = [1, 4, 4], strides = [1, 1, 1]} : vector<18x4x4xbf16> to vector<1x4x4xbf16>
      %28 = vector.shape_cast %27 : vector<1x4x4xbf16> to vector<4x4xbf16>
      %cst_22 = arith.constant dense<0.000000e+00> : vector<4x288xf32>
      %29 = tpu.matmul %28, %26, %cst_22 {dimension_numbers = #tpu.dot_dimension_numbers<[1], [0], [0], [1], [0, 0, 1, 1], [], []>} : vector<4x4xbf16>, vector<4x288xbf16>, vector<4x288xf32> -> vector<4x288xf32>
      %30 = arith.addf %24, %29 : vector<4x288xf32>
      %c0_23 = arith.constant 0 : index
      %c111 = arith.constant 111 : index
      %31 = vector.load %arg6[%c0_23, %c111] : memref<4x451xf32, #tpu.memory_space<vmem>>, vector<4x288xf32>
      %32 = arith.truncf %31 : vector<4x288xf32> to vector<4x288xbf16>
      %33 = vector.extract_strided_slice %11 {offsets = [2, 0, 0], sizes = [1, 4, 4], strides = [1, 1, 1]} : vector<18x4x4xbf16> to vector<1x4x4xbf16>
      %34 = vector.shape_cast %33 : vector<1x4x4xbf16> to vector<4x4xbf16>
      %cst_24 = arith.constant dense<0.000000e+00> : vector<4x288xf32>
      %35 = tpu.matmul %34, %32, %cst_24 {dimension_numbers = #tpu.dot_dimension_numbers<[1], [0], [0], [1], [0, 0, 1, 1], [], []>} : vector<4x4xbf16>, vector<4x288xbf16>, vector<4x288xf32> -> vector<4x288xf32>
      %36 = arith.addf %30, %35 : vector<4x288xf32>
      %c0_25 = arith.constant 0 : index
      %c127 = arith.constant 127 : index
      %37 = vector.load %arg6[%c0_25, %c127] : memref<4x451xf32, #tpu.memory_space<vmem>>, vector<4x288xf32>
      %38 = arith.truncf %37 : vector<4x288xf32> to vector<4x288xbf16>
      %39 = vector.extract_strided_slice %11 {offsets = [3, 0, 0], sizes = [1, 4, 4], strides = [1, 1, 1]} : vector<18x4x4xbf16> to vector<1x4x4xbf16>
      %40 = vector.shape_cast %39 : vector<1x4x4xbf16> to vector<4x4xbf16>
      %cst_26 = arith.constant dense<0.000000e+00> : vector<4x288xf32>
      %41 = tpu.matmul %40, %38, %cst_26 {dimension_numbers = #tpu.dot_dimension_numbers<[1], [0], [0], [1], [0, 0, 1, 1], [], []>} : vector<4x4xbf16>, vector<4x288xbf16>, vector<4x288xf32> -> vector<4x288xf32>
      %42 = arith.addf %36, %41 : vector<4x288xf32>
      %c0_27 = arith.constant 0 : index
      %c128_28 = arith.constant 128 : index
      %43 = vector.load %arg6[%c0_27, %c128_28] : memref<4x451xf32, #tpu.memory_space<vmem>>, vector<4x288xf32>
      %44 = arith.truncf %43 : vector<4x288xf32> to vector<4x288xbf16>
      %45 = vector.extract_strided_slice %11 {offsets = [4, 0, 0], sizes = [1, 4, 4], strides = [1, 1, 1]} : vector<18x4x4xbf16> to vector<1x4x4xbf16>
      %46 = vector.shape_cast %45 : vector<1x4x4xbf16> to vector<4x4xbf16>
      %cst_29 = arith.constant dense<0.000000e+00> : vector<4x288xf32>
      %47 = tpu.matmul %46, %44, %cst_29 {dimension_numbers = #tpu.dot_dimension_numbers<[1], [0], [0], [1], [0, 0, 1, 1], [], []>} : vector<4x4xbf16>, vector<4x288xbf16>, vector<4x288xf32> -> vector<4x288xf32>
      %48 = arith.addf %42, %47 : vector<4x288xf32>
      %c0_30 = arith.constant 0 : index
      %c129 = arith.constant 129 : index
      %49 = vector.load %arg6[%c0_30, %c129] : memref<4x451xf32, #tpu.memory_space<vmem>>, vector<4x288xf32>
      %50 = arith.truncf %49 : vector<4x288xf32> to vector<4x288xbf16>
      %51 = vector.extract_strided_slice %11 {offsets = [5, 0, 0], sizes = [1, 4, 4], strides = [1, 1, 1]} : vector<18x4x4xbf16> to vector<1x4x4xbf16>
      %52 = vector.shape_cast %51 : vector<1x4x4xbf16> to vector<4x4xbf16>
      %cst_31 = arith.constant dense<0.000000e+00> : vector<4x288xf32>
      %53 = tpu.matmul %52, %50, %cst_31 {dimension_numbers = #tpu.dot_dimension_numbers<[1], [0], [0], [1], [0, 0, 1, 1], [], []>} : vector<4x4xbf16>, vector<4x288xbf16>, vector<4x288xf32> -> vector<4x288xf32>
      %54 = arith.addf %48, %53 : vector<4x288xf32>
      %c0_32 = arith.constant 0 : index
      %c145 = arith.constant 145 : index
      %55 = vector.load %arg6[%c0_32, %c145] : memref<4x451xf32, #tpu.memory_space<vmem>>, vector<4x288xf32>
      %56 = arith.truncf %55 : vector<4x288xf32> to vector<4x288xbf16>
      %57 = vector.extract_strided_slice %11 {offsets = [6, 0, 0], sizes = [1, 4, 4], strides = [1, 1, 1]} : vector<18x4x4xbf16> to vector<1x4x4xbf16>
      %58 = vector.shape_cast %57 : vector<1x4x4xbf16> to vector<4x4xbf16>
      %cst_33 = arith.constant dense<0.000000e+00> : vector<4x288xf32>
      %59 = tpu.matmul %58, %56, %cst_33 {dimension_numbers = #tpu.dot_dimension_numbers<[1], [0], [0], [1], [0, 0, 1, 1], [], []>} : vector<4x4xbf16>, vector<4x288xbf16>, vector<4x288xf32> -> vector<4x288xf32>
      %60 = arith.addf %54, %59 : vector<4x288xf32>
      %c0_34 = arith.constant 0 : index
      %c146 = arith.constant 146 : index
      %61 = vector.load %arg6[%c0_34, %c146] : memref<4x451xf32, #tpu.memory_space<vmem>>, vector<4x288xf32>
      %62 = arith.truncf %61 : vector<4x288xf32> to vector<4x288xbf16>
      %63 = vector.extract_strided_slice %11 {offsets = [7, 0, 0], sizes = [1, 4, 4], strides = [1, 1, 1]} : vector<18x4x4xbf16> to vector<1x4x4xbf16>
      %64 = vector.shape_cast %63 : vector<1x4x4xbf16> to vector<4x4xbf16>
      %cst_35 = arith.constant dense<0.000000e+00> : vector<4x288xf32>
      %65 = tpu.matmul %64, %62, %cst_35 {dimension_numbers = #tpu.dot_dimension_numbers<[1], [0], [0], [1], [0, 0, 1, 1], [], []>} : vector<4x4xbf16>, vector<4x288xbf16>, vector<4x288xf32> -> vector<4x288xf32>
      %66 = arith.addf %60, %65 : vector<4x288xf32>
      %c0_36 = arith.constant 0 : index
      %c147 = arith.constant 147 : index
      %67 = vector.load %arg6[%c0_36, %c147] : memref<4x451xf32, #tpu.memory_space<vmem>>, vector<4x288xf32>
      %68 = arith.truncf %67 : vector<4x288xf32> to vector<4x288xbf16>
      %69 = vector.extract_strided_slice %11 {offsets = [8, 0, 0], sizes = [1, 4, 4], strides = [1, 1, 1]} : vector<18x4x4xbf16> to vector<1x4x4xbf16>
      %70 = vector.shape_cast %69 : vector<1x4x4xbf16> to vector<4x4xbf16>
      %cst_37 = arith.constant dense<0.000000e+00> : vector<4x288xf32>
      %71 = tpu.matmul %70, %68, %cst_37 {dimension_numbers = #tpu.dot_dimension_numbers<[1], [0], [0], [1], [0, 0, 1, 1], [], []>} : vector<4x4xbf16>, vector<4x288xbf16>, vector<4x288xf32> -> vector<4x288xf32>
      %72 = arith.addf %66, %71 : vector<4x288xf32>
      %73 = vector.broadcast %17 : vector<4x1xf32> to vector<4x288xf32>
      %74 = arith.addf %72, %73 : vector<4x288xf32>
      %cst_38 = arith.constant 0.000000e+00 : f32
      %75 = vector.broadcast %cst_38 : f32 to vector<4x288xf32>
      %76 = arith.maximumf %74, %75 : vector<4x288xf32>
      %77 = vector.broadcast %0 : vector<1x288xf32> to vector<4x288xf32>
      %78 = arith.mulf %76, %77 : vector<4x288xf32>
      %c0_39 = arith.constant 0 : index
      %c128_40 = arith.constant 128 : index
      %79 = vector.load %arg6[%c0_39, %c128_40] : memref<4x451xf32, #tpu.memory_space<vmem>>, vector<4x288xf32>
      tpu.vector_store %arg6[%c0_39, %c128_40], %78 {strides = array<i32>} : memref<4x451xf32, #tpu.memory_space<vmem>>, vector<4x288xf32>,
      %80 = vector.extract_strided_slice %14 {offsets = [1, 0, 0], sizes = [1, 4, 1], strides = [1, 1, 1]} : vector<2x4x1xf32> to vector<1x4x1xf32>
      %81 = vector.shape_cast %80 : vector<1x4x1xf32> to vector<4x1xf32>
      %cst_41 = arith.constant 0.000000e+00 : f32
      %82 = vector.broadcast %cst_41 : f32 to vector<4x288xf32>
      %c0_42 = arith.constant 0 : index
      %c109_43 = arith.constant 109 : index
      %83 = vector.load %arg6[%c0_42, %c109_43] : memref<4x451xf32, #tpu.memory_space<vmem>>, vector<4x288xf32>
      %84 = arith.truncf %83 : vector<4x288xf32> to vector<4x288xbf16>
      %85 = vector.extract_strided_slice %11 {offsets = [9, 0, 0], sizes = [1, 4, 4], strides = [1, 1, 1]} : vector<18x4x4xbf16> to vector<1x4x4xbf16>
      %86 = vector.shape_cast %85 : vector<1x4x4xbf16> to vector<4x4xbf16>
      %cst_44 = arith.constant dense<0.000000e+00> : vector<4x288xf32>
      %87 = tpu.matmul %86, %84, %cst_44 {dimension_numbers = #tpu.dot_dimension_numbers<[1], [0], [0], [1], [0, 0, 1, 1], [], []>} : vector<4x4xbf16>, vector<4x288xbf16>, vector<4x288xf32> -> vector<4x288xf32>
      %88 = arith.addf %82, %87 : vector<4x288xf32>
      %c0_45 = arith.constant 0 : index
      %c110_46 = arith.constant 110 : index
      %89 = vector.load %arg6[%c0_45, %c110_46] : memref<4x451xf32, #tpu.memory_space<vmem>>, vector<4x288xf32>
      %90 = arith.truncf %89 : vector<4x288xf32> to vector<4x288xbf16>
      %91 = vector.extract_strided_slice %11 {offsets = [10, 0, 0], sizes = [1, 4, 4], strides = [1, 1, 1]} : vector<18x4x4xbf16> to vector<1x4x4xbf16>
      %92 = vector.shape_cast %91 : vector<1x4x4xbf16> to vector<4x4xbf16>
      %cst_47 = arith.constant dense<0.000000e+00> : vector<4x288xf32>
      %93 = tpu.matmul %92, %90, %cst_47 {dimension_numbers = #tpu.dot_dimension_numbers<[1], [0], [0], [1], [0, 0, 1, 1], [], []>} : vector<4x4xbf16>, vector<4x288xbf16>, vector<4x288xf32> -> vector<4x288xf32>
      %94 = arith.addf %88, %93 : vector<4x288xf32>
      %c0_48 = arith.constant 0 : index
      %c111_49 = arith.constant 111 : index
      %95 = vector.load %arg6[%c0_48, %c111_49] : memref<4x451xf32, #tpu.memory_space<vmem>>, vector<4x288xf32>
      %96 = arith.truncf %95 : vector<4x288xf32> to vector<4x288xbf16>
      %97 = vector.extract_strided_slice %11 {offsets = [11, 0, 0], sizes = [1, 4, 4], strides = [1, 1, 1]} : vector<18x4x4xbf16> to vector<1x4x4xbf16>
      %98 = vector.shape_cast %97 : vector<1x4x4xbf16> to vector<4x4xbf16>
      %cst_50 = arith.constant dense<0.000000e+00> : vector<4x288xf32>
      %99 = tpu.matmul %98, %96, %cst_50 {dimension_numbers = #tpu.dot_dimension_numbers<[1], [0], [0], [1], [0, 0, 1, 1], [], []>} : vector<4x4xbf16>, vector<4x288xbf16>, vector<4x288xf32> -> vector<4x288xf32>
      %100 = arith.addf %94, %99 : vector<4x288xf32>
      %c0_51 = arith.constant 0 : index
      %c127_52 = arith.constant 127 : index
      %101 = vector.load %arg6[%c0_51, %c127_52] : memref<4x451xf32, #tpu.memory_space<vmem>>, vector<4x288xf32>
      %102 = arith.truncf %101 : vector<4x288xf32> to vector<4x288xbf16>
      %103 = vector.extract_strided_slice %11 {offsets = [12, 0, 0], sizes = [1, 4, 4], strides = [1, 1, 1]} : vector<18x4x4xbf16> to vector<1x4x4xbf16>
      %104 = vector.shape_cast %103 : vector<1x4x4xbf16> to vector<4x4xbf16>
      %cst_53 = arith.constant dense<0.000000e+00> : vector<4x288xf32>
      %105 = tpu.matmul %104, %102, %cst_53 {dimension_numbers = #tpu.dot_dimension_numbers<[1], [0], [0], [1], [0, 0, 1, 1], [], []>} : vector<4x4xbf16>, vector<4x288xbf16>, vector<4x288xf32> -> vector<4x288xf32>
      %106 = arith.addf %100, %105 : vector<4x288xf32>
      %c0_54 = arith.constant 0 : index
      %c128_55 = arith.constant 128 : index
      %107 = vector.load %arg6[%c0_54, %c128_55] : memref<4x451xf32, #tpu.memory_space<vmem>>, vector<4x288xf32>
      %108 = arith.truncf %107 : vector<4x288xf32> to vector<4x288xbf16>
      %109 = vector.extract_strided_slice %11 {offsets = [13, 0, 0], sizes = [1, 4, 4], strides = [1, 1, 1]} : vector<18x4x4xbf16> to vector<1x4x4xbf16>
      %110 = vector.shape_cast %109 : vector<1x4x4xbf16> to vector<4x4xbf16>
      %cst_56 = arith.constant dense<0.000000e+00> : vector<4x288xf32>
      %111 = tpu.matmul %110, %108, %cst_56 {dimension_numbers = #tpu.dot_dimension_numbers<[1], [0], [0], [1], [0, 0, 1, 1], [], []>} : vector<4x4xbf16>, vector<4x288xbf16>, vector<4x288xf32> -> vector<4x288xf32>
      %112 = arith.addf %106, %111 : vector<4x288xf32>
      %c0_57 = arith.constant 0 : index
      %c129_58 = arith.constant 129 : index
      %113 = vector.load %arg6[%c0_57, %c129_58] : memref<4x451xf32, #tpu.memory_space<vmem>>, vector<4x288xf32>
      %114 = arith.truncf %113 : vector<4x288xf32> to vector<4x288xbf16>
      %115 = vector.extract_strided_slice %11 {offsets = [14, 0, 0], sizes = [1, 4, 4], strides = [1, 1, 1]} : vector<18x4x4xbf16> to vector<1x4x4xbf16>
      %116 = vector.shape_cast %115 : vector<1x4x4xbf16> to vector<4x4xbf16>
      %cst_59 = arith.constant dense<0.000000e+00> : vector<4x288xf32>
      %117 = tpu.matmul %116, %114, %cst_59 {dimension_numbers = #tpu.dot_dimension_numbers<[1], [0], [0], [1], [0, 0, 1, 1], [], []>} : vector<4x4xbf16>, vector<4x288xbf16>, vector<4x288xf32> -> vector<4x288xf32>
      %118 = arith.addf %112, %117 : vector<4x288xf32>
      %c0_60 = arith.constant 0 : index
      %c145_61 = arith.constant 145 : index
      %119 = vector.load %arg6[%c0_60, %c145_61] : memref<4x451xf32, #tpu.memory_space<vmem>>, vector<4x288xf32>
      %120 = arith.truncf %119 : vector<4x288xf32> to vector<4x288xbf16>
      %121 = vector.extract_strided_slice %11 {offsets = [15, 0, 0], sizes = [1, 4, 4], strides = [1, 1, 1]} : vector<18x4x4xbf16> to vector<1x4x4xbf16>
      %122 = vector.shape_cast %121 : vector<1x4x4xbf16> to vector<4x4xbf16>
      %cst_62 = arith.constant dense<0.000000e+00> : vector<4x288xf32>
      %123 = tpu.matmul %122, %120, %cst_62 {dimension_numbers = #tpu.dot_dimension_numbers<[1], [0], [0], [1], [0, 0, 1, 1], [], []>} : vector<4x4xbf16>, vector<4x288xbf16>, vector<4x288xf32> -> vector<4x288xf32>
      %124 = arith.addf %118, %123 : vector<4x288xf32>
      %c0_63 = arith.constant 0 : index
      %c146_64 = arith.constant 146 : index
      %125 = vector.load %arg6[%c0_63, %c146_64] : memref<4x451xf32, #tpu.memory_space<vmem>>, vector<4x288xf32>
      %126 = arith.truncf %125 : vector<4x288xf32> to vector<4x288xbf16>
      %127 = vector.extract_strided_slice %11 {offsets = [16, 0, 0], sizes = [1, 4, 4], strides = [1, 1, 1]} : vector<18x4x4xbf16> to vector<1x4x4xbf16>
      %128 = vector.shape_cast %127 : vector<1x4x4xbf16> to vector<4x4xbf16>
      %cst_65 = arith.constant dense<0.000000e+00> : vector<4x288xf32>
      %129 = tpu.matmul %128, %126, %cst_65 {dimension_numbers = #tpu.dot_dimension_numbers<[1], [0], [0], [1], [0, 0, 1, 1], [], []>} : vector<4x4xbf16>, vector<4x288xbf16>, vector<4x288xf32> -> vector<4x288xf32>
      %130 = arith.addf %124, %129 : vector<4x288xf32>
      %c0_66 = arith.constant 0 : index
      %c147_67 = arith.constant 147 : index
      %131 = vector.load %arg6[%c0_66, %c147_67] : memref<4x451xf32, #tpu.memory_space<vmem>>, vector<4x288xf32>
      %132 = arith.truncf %131 : vector<4x288xf32> to vector<4x288xbf16>
      %133 = vector.extract_strided_slice %11 {offsets = [17, 0, 0], sizes = [1, 4, 4], strides = [1, 1, 1]} : vector<18x4x4xbf16> to vector<1x4x4xbf16>
      %134 = vector.shape_cast %133 : vector<1x4x4xbf16> to vector<4x4xbf16>
      %cst_68 = arith.constant dense<0.000000e+00> : vector<4x288xf32>
      %135 = tpu.matmul %134, %132, %cst_68 {dimension_numbers = #tpu.dot_dimension_numbers<[1], [0], [0], [1], [0, 0, 1, 1], [], []>} : vector<4x4xbf16>, vector<4x288xbf16>, vector<4x288xf32> -> vector<4x288xf32>
      %136 = arith.addf %130, %135 : vector<4x288xf32>
      %137 = vector.broadcast %81 : vector<4x1xf32> to vector<4x288xf32>
      %138 = arith.addf %136, %137 : vector<4x288xf32>
      %cst_69 = arith.constant 0.000000e+00 : f32
      %139 = vector.broadcast %cst_69 : f32 to vector<4x288xf32>
      %140 = arith.maximumf %138, %139 : vector<4x288xf32>
      %141 = arith.addf %15, %140 : vector<4x288xf32>
      %142 = vector.broadcast %0 : vector<1x288xf32> to vector<4x288xf32>
      %143 = arith.mulf %141, %142 : vector<4x288xf32>
      %c0_70 = arith.constant 0 : index
      %c128_71 = arith.constant 128 : index
      %144 = vector.load %arg6[%c0_70, %c128_71] : memref<4x451xf32, #tpu.memory_space<vmem>>, vector<4x288xf32>
      tpu.vector_store %arg6[%c0_70, %c128_71], %143 {strides = array<i32>} : memref<4x451xf32, #tpu.memory_space<vmem>>, vector<4x288xf32>,
    }
    %c2_i32_6 = arith.constant 2 : i32
    %c0_7 = arith.constant 0 : index
    %c128 = arith.constant 128 : index
    %5 = vector.load %arg6[%c0_7, %c128] : memref<4x451xf32, #tpu.memory_space<vmem>>, vector<4x288xf32>
    %c0_8 = arith.constant 0 : index
    %c0_9 = arith.constant 0 : index
    %c0_10 = arith.constant 0 : index
    %6 = vector.load %arg5[%c0_8, %c0_9, %c0_10] : memref<1x4x288xf32, #tpu.memory_space<vmem>>, vector<1x4x288xf32>
    %7 = vector.shape_cast %6 : vector<1x4x288xf32> to vector<4x288xf32>
    %8 = vector.shape_cast %5 : vector<4x288xf32> to vector<1x4x288xf32>
    tpu.vector_store %arg5[%c0_8, %c0_9, %c0_10], %8 {strides = array<i32>} : memref<1x4x288xf32, #tpu.memory_space<vmem>>, vector<1x4x288xf32>,
    return
  }
  func.func @transform_0(%arg0: i32) -> (i32, i32, i32) {
    %c0_i32 = arith.constant 0 : i32
    %c0_i32_0 = arith.constant 0 : i32
    %c0_i32_1 = arith.constant 0 : i32
    return %arg0, %c0_i32, %c0_i32_0 : i32, i32, i32
  }
  func.func @transform_1(%arg0: i32) -> (i32, i32, i32, i32) {
    %c0_i32 = arith.constant 0 : i32
    %c0_i32_0 = arith.constant 0 : i32
    %c0_i32_1 = arith.constant 0 : i32
    %c0_i32_2 = arith.constant 0 : i32
    %c0_i32_3 = arith.constant 0 : i32
    return %c0_i32, %c0_i32_0, %c0_i32_1, %c0_i32_2 : i32, i32, i32, i32
  }
  func.func @transform_2(%arg0: i32) -> (i32, i32, i32, i32) {
    %c0_i32 = arith.constant 0 : i32
    %c0_i32_0 = arith.constant 0 : i32
    %c0_i32_1 = arith.constant 0 : i32
    %c0_i32_2 = arith.constant 0 : i32
    %c0_i32_3 = arith.constant 0 : i32
    return %c0_i32, %c0_i32_0, %c0_i32_1, %c0_i32_2 : i32, i32, i32, i32
  }
  func.func @transform_3(%arg0: i32) -> (i32, i32) {
    %c0_i32 = arith.constant 0 : i32
    %c0_i32_0 = arith.constant 0 : i32
    %c0_i32_1 = arith.constant 0 : i32
    return %c0_i32, %c0_i32_0 : i32, i32
  }
  func.func @transform_4(%arg0: i32) -> (i32, i32, i32) {
    %c0_i32 = arith.constant 0 : i32
    %c0_i32_0 = arith.constant 0 : i32
    %c0_i32_1 = arith.constant 0 : i32
    return %arg0, %c0_i32, %c0_i32_0 : i32, i32, i32
  }
}

module attributes {stable_mosaic.version = 11 : i64} {
  func.func @kernel(%arg0: i32, %arg1: memref<1x4x451xf32, #tpu.memory_space<vmem>>, %arg2: memref<2x18x4x4xbf16, #tpu.memory_space<vmem>>, %arg3: memref<2x2x4x1xf32, #tpu.memory_space<vmem>>, %arg4: memref<1x288xf32, #tpu.memory_space<vmem>>, %arg5: memref<1x4x288xf32, #tpu.memory_space<vmem>>, %arg6: memref<4x451xf32, #tpu.memory_space<vmem>>) attributes {dimension_semantics = [#tpu.dimension_semantics<parallel>], iteration_bounds = array<i64: 2>, scalar_prefetch = 0 : i64, scratch_operands = 1 : i64, tpu.core_type = #tpu.core_type<tc>, window_params = [{transform_indices = @transform_0, window_bounds = array<i64: 1, 4, 451>}, {pipeline_mode = #tpu.pipeline_mode<synchronous>, transform_indices = @transform_1, window_bounds = array<i64: 2, 18, 4, 4>}, {pipeline_mode = #tpu.pipeline_mode<synchronous>, transform_indices = @transform_2, window_bounds = array<i64: 2, 2, 4, 1>}, {pipeline_mode = #tpu.pipeline_mode<synchronous>, transform_indices = @transform_3, window_bounds = array<i64: 1, 288>}, {transform_indices = @transform_4, window_bounds = array<i64: 1, 4, 288>}]} {
    %c0 = arith.constant 0 : index
    %c0_0 = arith.constant 0 : index
    %0 = vector.load %arg4[%c0, %c0_0] : memref<1x288xf32, #tpu.memory_space<vmem>>, vector<1x288xf32>
    %c0_1 = arith.constant 0 : index
    %c0_2 = arith.constant 0 : index
    %c0_3 = arith.constant 0 : index
    %1 = vector.load %arg1[%c0_1, %c0_2, %c0_3] : memref<1x4x451xf32, #tpu.memory_space<vmem>>, vector<1x4x451xf32>
    %2 = vector.shape_cast %1 : vector<1x4x451xf32> to vector<4x451xf32>
    %c0_4 = arith.constant 0 : index
    %c0_5 = arith.constant 0 : index
    %3 = vector.load %arg6[%c0_4, %c0_5] : memref<4x451xf32, #tpu.memory_space<vmem>>, vector<4x451xf32>
    tpu.vector_store %arg6[%c0_4, %c0_5], %2 {strides = array<i32>} : memref<4x451xf32, #tpu.memory_space<vmem>>, vector<4x451xf32>,
    %c0_i32 = arith.constant 0 : i32
    %c2_i32 = arith.constant 2 : i32
    %4 = arith.addi %c0_i32, %c2_i32 : i32
    %c1_i32 = arith.constant 1 : i32
    scf.for %arg7 = %c0_i32 to %4 step %c1_i32  : i32 {
      %9 = arith.index_cast %arg7 : i32 to index
      %c0_11 = arith.constant 0 : index
      %c0_12 = arith.constant 0 : index
      %c0_13 = arith.constant 0 : index
      %10 = vector.load %arg2[%9, %c0_11, %c0_12, %c0_13] : memref<2x18x4x4xbf16, #tpu.memory_space<vmem>>, vector<1x18x4x4xbf16>
      %11 = vector.shape_cast %10 : vector<1x18x4x4xbf16> to vector<18x4x4xbf16>
      %12 = arith.index_cast %arg7 : i32 to index
      %c0_14 = arith.constant 0 : index
      %c0_15 = arith.constant 0 : index
      %c0_16 = arith.constant 0 : index
      %13 = vector.load %arg3[%12, %c0_14, %c0_15, %c0_16] : memref<2x2x4x1xf32, #tpu.memory_space<vmem>>, vector<1x2x4x1xf32>
      %14 = vector.shape_cast %13 : vector<1x2x4x1xf32> to vector<2x4x1xf32>
      %c0_17 = arith.constant 0 : index
      %c128_18 = arith.constant 128 : index
      %15 = vector.load %arg6[%c0_17, %c128_18] : memref<4x451xf32, #tpu.memory_space<vmem>>, vector<4x288xf32>
      %16 = vector.extract_strided_slice %14 {offsets = [0, 0, 0], sizes = [1, 4, 1], strides = [1, 1, 1]} : vector<2x4x1xf32> to vector<1x4x1xf32>
      %17 = vector.shape_cast %16 : vector<1x4x1xf32> to vector<4x1xf32>
      %cst = arith.constant 0.000000e+00 : f32
      %18 = vector.broadcast %cst : f32 to vector<4x288xf32>
      %c0_19 = arith.constant 0 : index
      %c109 = arith.constant 109 : index
      %19 = vector.load %arg6[%c0_19, %c109] : memref<4x451xf32, #tpu.memory_space<vmem>>, vector<4x288xf32>
      %20 = arith.truncf %19 : vector<4x288xf32> to vector<4x288xbf16>
      %21 = vector.extract_strided_slice %11 {offsets = [0, 0, 0], sizes = [1, 4, 4], strides = [1, 1, 1]} : vector<18x4x4xbf16> to vector<1x4x4xbf16>
      %22 = vector.shape_cast %21 : vector<1x4x4xbf16> to vector<4x4xbf16>
      %cst_20 = arith.constant dense<0.000000e+00> : vector<4x288xf32>
      %23 = tpu.matmul %22, %20, %cst_20 {dimension_numbers = #tpu.dot_dimension_numbers<[1], [0], [0], [1], [0, 0, 1, 1], [], []>} : vector<4x4xbf16>, vector<4x288xbf16>, vector<4x288xf32> -> vector<4x288xf32>
      %24 = arith.addf %18, %23 : vector<4x288xf32>
      %c0_21 = arith.constant 0 : index
      %c110 = arith.constant 110 : index
      %25 = vector.load %arg6[%c0_21, %c110] : memref<4x451xf32, #tpu.memory_space<vmem>>, vector<4x288xf32>
      %26 = arith.truncf %25 : vector<4x288xf32> to vector<4x288xbf16>
      %27 = vector.extract_strided_slice %11 {offsets = [1, 0, 0], sizes = [1, 4, 4], strides = [1, 1, 1]} : vector<18x4x4xbf16> to vector<1x4x4xbf16>
      %28 = vector.shape_cast %27 : vector<1x4x4xbf16> to vector<4x4xbf16>
      %cst_22 = arith.constant dense<0.000000e+00> : vector<4x288xf32>
      %29 = tpu.matmul %28, %26, %cst_22 {dimension_numbers = #tpu.dot_dimension_numbers<[1], [0], [0], [1], [0, 0, 1, 1], [], []>} : vector<4x4xbf16>, vector<4x288xbf16>, vector<4x288xf32> -> vector<4x288xf32>
      %30 = arith.addf %24, %29 : vector<4x288xf32>
      %c0_23 = arith.constant 0 : index
      %c111 = arith.constant 111 : index
      %31 = vector.load %arg6[%c0_23, %c111] : memref<4x451xf32, #tpu.memory_space<vmem>>, vector<4x288xf32>
      %32 = arith.truncf %31 : vector<4x288xf32> to vector<4x288xbf16>
      %33 = vector.extract_strided_slice %11 {offsets = [2, 0, 0], sizes = [1, 4, 4], strides = [1, 1, 1]} : vector<18x4x4xbf16> to vector<1x4x4xbf16>
      %34 = vector.shape_cast %33 : vector<1x4x4xbf16> to vector<4x4xbf16>
      %cst_24 = arith.constant dense<0.000000e+00> : vector<4x288xf32>
      %35 = tpu.matmul %34, %32, %cst_24 {dimension_numbers = #tpu.dot_dimension_numbers<[1], [0], [0], [1], [0, 0, 1, 1], [], []>} : vector<4x4xbf16>, vector<4x288xbf16>, vector<4x288xf32> -> vector<4x288xf32>
      %36 = arith.addf %30, %35 : vector<4x288xf32>
      %c0_25 = arith.constant 0 : index
      %c127 = arith.constant 127 : index
      %37 = vector.load %arg6[%c0_25, %c127] : memref<4x451xf32, #tpu.memory_space<vmem>>, vector<4x288xf32>
      %38 = arith.truncf %37 : vector<4x288xf32> to vector<4x288xbf16>
      %39 = vector.extract_strided_slice %11 {offsets = [3, 0, 0], sizes = [1, 4, 4], strides = [1, 1, 1]} : vector<18x4x4xbf16> to vector<1x4x4xbf16>
      %40 = vector.shape_cast %39 : vector<1x4x4xbf16> to vector<4x4xbf16>
      %cst_26 = arith.constant dense<0.000000e+00> : vector<4x288xf32>
      %41 = tpu.matmul %40, %38, %cst_26 {dimension_numbers = #tpu.dot_dimension_numbers<[1], [0], [0], [1], [0, 0, 1, 1], [], []>} : vector<4x4xbf16>, vector<4x288xbf16>, vector<4x288xf32> -> vector<4x288xf32>
      %42 = arith.addf %36, %41 : vector<4x288xf32>
      %c0_27 = arith.constant 0 : index
      %c128_28 = arith.constant 128 : index
      %43 = vector.load %arg6[%c0_27, %c128_28] : memref<4x451xf32, #tpu.memory_space<vmem>>, vector<4x288xf32>
      %44 = arith.truncf %43 : vector<4x288xf32> to vector<4x288xbf16>
      %45 = vector.extract_strided_slice %11 {offsets = [4, 0, 0], sizes = [1, 4, 4], strides = [1, 1, 1]} : vector<18x4x4xbf16> to vector<1x4x4xbf16>
      %46 = vector.shape_cast %45 : vector<1x4x4xbf16> to vector<4x4xbf16>
      %cst_29 = arith.constant dense<0.000000e+00> : vector<4x288xf32>
      %47 = tpu.matmul %46, %44, %cst_29 {dimension_numbers = #tpu.dot_dimension_numbers<[1], [0], [0], [1], [0, 0, 1, 1], [], []>} : vector<4x4xbf16>, vector<4x288xbf16>, vector<4x288xf32> -> vector<4x288xf32>
      %48 = arith.addf %42, %47 : vector<4x288xf32>
      %c0_30 = arith.constant 0 : index
      %c129 = arith.constant 129 : index
      %49 = vector.load %arg6[%c0_30, %c129] : memref<4x451xf32, #tpu.memory_space<vmem>>, vector<4x288xf32>
      %50 = arith.truncf %49 : vector<4x288xf32> to vector<4x288xbf16>
      %51 = vector.extract_strided_slice %11 {offsets = [5, 0, 0], sizes = [1, 4, 4], strides = [1, 1, 1]} : vector<18x4x4xbf16> to vector<1x4x4xbf16>
      %52 = vector.shape_cast %51 : vector<1x4x4xbf16> to vector<4x4xbf16>
      %cst_31 = arith.constant dense<0.000000e+00> : vector<4x288xf32>
      %53 = tpu.matmul %52, %50, %cst_31 {dimension_numbers = #tpu.dot_dimension_numbers<[1], [0], [0], [1], [0, 0, 1, 1], [], []>} : vector<4x4xbf16>, vector<4x288xbf16>, vector<4x288xf32> -> vector<4x288xf32>
      %54 = arith.addf %48, %53 : vector<4x288xf32>
      %c0_32 = arith.constant 0 : index
      %c145 = arith.constant 145 : index
      %55 = vector.load %arg6[%c0_32, %c145] : memref<4x451xf32, #tpu.memory_space<vmem>>, vector<4x288xf32>
      %56 = arith.truncf %55 : vector<4x288xf32> to vector<4x288xbf16>
      %57 = vector.extract_strided_slice %11 {offsets = [6, 0, 0], sizes = [1, 4, 4], strides = [1, 1, 1]} : vector<18x4x4xbf16> to vector<1x4x4xbf16>
      %58 = vector.shape_cast %57 : vector<1x4x4xbf16> to vector<4x4xbf16>
      %cst_33 = arith.constant dense<0.000000e+00> : vector<4x288xf32>
      %59 = tpu.matmul %58, %56, %cst_33 {dimension_numbers = #tpu.dot_dimension_numbers<[1], [0], [0], [1], [0, 0, 1, 1], [], []>} : vector<4x4xbf16>, vector<4x288xbf16>, vector<4x288xf32> -> vector<4x288xf32>
      %60 = arith.addf %54, %59 : vector<4x288xf32>
      %c0_34 = arith.constant 0 : index
      %c146 = arith.constant 146 : index
      %61 = vector.load %arg6[%c0_34, %c146] : memref<4x451xf32, #tpu.memory_space<vmem>>, vector<4x288xf32>
      %62 = arith.truncf %61 : vector<4x288xf32> to vector<4x288xbf16>
      %63 = vector.extract_strided_slice %11 {offsets = [7, 0, 0], sizes = [1, 4, 4], strides = [1, 1, 1]} : vector<18x4x4xbf16> to vector<1x4x4xbf16>
      %64 = vector.shape_cast %63 : vector<1x4x4xbf16> to vector<4x4xbf16>
      %cst_35 = arith.constant dense<0.000000e+00> : vector<4x288xf32>
      %65 = tpu.matmul %64, %62, %cst_35 {dimension_numbers = #tpu.dot_dimension_numbers<[1], [0], [0], [1], [0, 0, 1, 1], [], []>} : vector<4x4xbf16>, vector<4x288xbf16>, vector<4x288xf32> -> vector<4x288xf32>
      %66 = arith.addf %60, %65 : vector<4x288xf32>
      %c0_36 = arith.constant 0 : index
      %c147 = arith.constant 147 : index
      %67 = vector.load %arg6[%c0_36, %c147] : memref<4x451xf32, #tpu.memory_space<vmem>>, vector<4x288xf32>
      %68 = arith.truncf %67 : vector<4x288xf32> to vector<4x288xbf16>
      %69 = vector.extract_strided_slice %11 {offsets = [8, 0, 0], sizes = [1, 4, 4], strides = [1, 1, 1]} : vector<18x4x4xbf16> to vector<1x4x4xbf16>
      %70 = vector.shape_cast %69 : vector<1x4x4xbf16> to vector<4x4xbf16>
      %cst_37 = arith.constant dense<0.000000e+00> : vector<4x288xf32>
      %71 = tpu.matmul %70, %68, %cst_37 {dimension_numbers = #tpu.dot_dimension_numbers<[1], [0], [0], [1], [0, 0, 1, 1], [], []>} : vector<4x4xbf16>, vector<4x288xbf16>, vector<4x288xf32> -> vector<4x288xf32>
      %72 = arith.addf %66, %71 : vector<4x288xf32>
      %73 = vector.broadcast %17 : vector<4x1xf32> to vector<4x288xf32>
      %74 = arith.addf %72, %73 : vector<4x288xf32>
      %cst_38 = arith.constant 0.000000e+00 : f32
      %75 = vector.broadcast %cst_38 : f32 to vector<4x288xf32>
      %76 = arith.maximumf %74, %75 : vector<4x288xf32>
      %77 = vector.broadcast %0 : vector<1x288xf32> to vector<4x288xf32>
      %78 = arith.mulf %76, %77 : vector<4x288xf32>
      %c0_39 = arith.constant 0 : index
      %c128_40 = arith.constant 128 : index
      %79 = vector.load %arg6[%c0_39, %c128_40] : memref<4x451xf32, #tpu.memory_space<vmem>>, vector<4x288xf32>
      tpu.vector_store %arg6[%c0_39, %c128_40], %78 {strides = array<i32>} : memref<4x451xf32, #tpu.memory_space<vmem>>, vector<4x288xf32>,
      %80 = vector.extract_strided_slice %14 {offsets = [1, 0, 0], sizes = [1, 4, 1], strides = [1, 1, 1]} : vector<2x4x1xf32> to vector<1x4x1xf32>
      %81 = vector.shape_cast %80 : vector<1x4x1xf32> to vector<4x1xf32>
      %cst_41 = arith.constant 0.000000e+00 : f32
      %82 = vector.broadcast %cst_41 : f32 to vector<4x288xf32>
      %c0_42 = arith.constant 0 : index
      %c109_43 = arith.constant 109 : index
      %83 = vector.load %arg6[%c0_42, %c109_43] : memref<4x451xf32, #tpu.memory_space<vmem>>, vector<4x288xf32>
      %84 = arith.truncf %83 : vector<4x288xf32> to vector<4x288xbf16>
      %85 = vector.extract_strided_slice %11 {offsets = [9, 0, 0], sizes = [1, 4, 4], strides = [1, 1, 1]} : vector<18x4x4xbf16> to vector<1x4x4xbf16>
      %86 = vector.shape_cast %85 : vector<1x4x4xbf16> to vector<4x4xbf16>
      %cst_44 = arith.constant dense<0.000000e+00> : vector<4x288xf32>
      %87 = tpu.matmul %86, %84, %cst_44 {dimension_numbers = #tpu.dot_dimension_numbers<[1], [0], [0], [1], [0, 0, 1, 1], [], []>} : vector<4x4xbf16>, vector<4x288xbf16>, vector<4x288xf32> -> vector<4x288xf32>
      %88 = arith.addf %82, %87 : vector<4x288xf32>
      %c0_45 = arith.constant 0 : index
      %c110_46 = arith.constant 110 : index
      %89 = vector.load %arg6[%c0_45, %c110_46] : memref<4x451xf32, #tpu.memory_space<vmem>>, vector<4x288xf32>
      %90 = arith.truncf %89 : vector<4x288xf32> to vector<4x288xbf16>
      %91 = vector.extract_strided_slice %11 {offsets = [10, 0, 0], sizes = [1, 4, 4], strides = [1, 1, 1]} : vector<18x4x4xbf16> to vector<1x4x4xbf16>
      %92 = vector.shape_cast %91 : vector<1x4x4xbf16> to vector<4x4xbf16>
      %cst_47 = arith.constant dense<0.000000e+00> : vector<4x288xf32>
      %93 = tpu.matmul %92, %90, %cst_47 {dimension_numbers = #tpu.dot_dimension_numbers<[1], [0], [0], [1], [0, 0, 1, 1], [], []>} : vector<4x4xbf16>, vector<4x288xbf16>, vector<4x288xf32> -> vector<4x288xf32>
      %94 = arith.addf %88, %93 : vector<4x288xf32>
      %c0_48 = arith.constant 0 : index
      %c111_49 = arith.constant 111 : index
      %95 = vector.load %arg6[%c0_48, %c111_49] : memref<4x451xf32, #tpu.memory_space<vmem>>, vector<4x288xf32>
      %96 = arith.truncf %95 : vector<4x288xf32> to vector<4x288xbf16>
      %97 = vector.extract_strided_slice %11 {offsets = [11, 0, 0], sizes = [1, 4, 4], strides = [1, 1, 1]} : vector<18x4x4xbf16> to vector<1x4x4xbf16>
      %98 = vector.shape_cast %97 : vector<1x4x4xbf16> to vector<4x4xbf16>
      %cst_50 = arith.constant dense<0.000000e+00> : vector<4x288xf32>
      %99 = tpu.matmul %98, %96, %cst_50 {dimension_numbers = #tpu.dot_dimension_numbers<[1], [0], [0], [1], [0, 0, 1, 1], [], []>} : vector<4x4xbf16>, vector<4x288xbf16>, vector<4x288xf32> -> vector<4x288xf32>
      %100 = arith.addf %94, %99 : vector<4x288xf32>
      %c0_51 = arith.constant 0 : index
      %c127_52 = arith.constant 127 : index
      %101 = vector.load %arg6[%c0_51, %c127_52] : memref<4x451xf32, #tpu.memory_space<vmem>>, vector<4x288xf32>
      %102 = arith.truncf %101 : vector<4x288xf32> to vector<4x288xbf16>
      %103 = vector.extract_strided_slice %11 {offsets = [12, 0, 0], sizes = [1, 4, 4], strides = [1, 1, 1]} : vector<18x4x4xbf16> to vector<1x4x4xbf16>
      %104 = vector.shape_cast %103 : vector<1x4x4xbf16> to vector<4x4xbf16>
      %cst_53 = arith.constant dense<0.000000e+00> : vector<4x288xf32>
      %105 = tpu.matmul %104, %102, %cst_53 {dimension_numbers = #tpu.dot_dimension_numbers<[1], [0], [0], [1], [0, 0, 1, 1], [], []>} : vector<4x4xbf16>, vector<4x288xbf16>, vector<4x288xf32> -> vector<4x288xf32>
      %106 = arith.addf %100, %105 : vector<4x288xf32>
      %c0_54 = arith.constant 0 : index
      %c128_55 = arith.constant 128 : index
      %107 = vector.load %arg6[%c0_54, %c128_55] : memref<4x451xf32, #tpu.memory_space<vmem>>, vector<4x288xf32>
      %108 = arith.truncf %107 : vector<4x288xf32> to vector<4x288xbf16>
      %109 = vector.extract_strided_slice %11 {offsets = [13, 0, 0], sizes = [1, 4, 4], strides = [1, 1, 1]} : vector<18x4x4xbf16> to vector<1x4x4xbf16>
      %110 = vector.shape_cast %109 : vector<1x4x4xbf16> to vector<4x4xbf16>
      %cst_56 = arith.constant dense<0.000000e+00> : vector<4x288xf32>
      %111 = tpu.matmul %110, %108, %cst_56 {dimension_numbers = #tpu.dot_dimension_numbers<[1], [0], [0], [1], [0, 0, 1, 1], [], []>} : vector<4x4xbf16>, vector<4x288xbf16>, vector<4x288xf32> -> vector<4x288xf32>
      %112 = arith.addf %106, %111 : vector<4x288xf32>
      %c0_57 = arith.constant 0 : index
      %c129_58 = arith.constant 129 : index
      %113 = vector.load %arg6[%c0_57, %c129_58] : memref<4x451xf32, #tpu.memory_space<vmem>>, vector<4x288xf32>
      %114 = arith.truncf %113 : vector<4x288xf32> to vector<4x288xbf16>
      %115 = vector.extract_strided_slice %11 {offsets = [14, 0, 0], sizes = [1, 4, 4], strides = [1, 1, 1]} : vector<18x4x4xbf16> to vector<1x4x4xbf16>
      %116 = vector.shape_cast %115 : vector<1x4x4xbf16> to vector<4x4xbf16>
      %cst_59 = arith.constant dense<0.000000e+00> : vector<4x288xf32>
      %117 = tpu.matmul %116, %114, %cst_59 {dimension_numbers = #tpu.dot_dimension_numbers<[1], [0], [0], [1], [0, 0, 1, 1], [], []>} : vector<4x4xbf16>, vector<4x288xbf16>, vector<4x288xf32> -> vector<4x288xf32>
      %118 = arith.addf %112, %117 : vector<4x288xf32>
      %c0_60 = arith.constant 0 : index
      %c145_61 = arith.constant 145 : index
      %119 = vector.load %arg6[%c0_60, %c145_61] : memref<4x451xf32, #tpu.memory_space<vmem>>, vector<4x288xf32>
      %120 = arith.truncf %119 : vector<4x288xf32> to vector<4x288xbf16>
      %121 = vector.extract_strided_slice %11 {offsets = [15, 0, 0], sizes = [1, 4, 4], strides = [1, 1, 1]} : vector<18x4x4xbf16> to vector<1x4x4xbf16>
      %122 = vector.shape_cast %121 : vector<1x4x4xbf16> to vector<4x4xbf16>
      %cst_62 = arith.constant dense<0.000000e+00> : vector<4x288xf32>
      %123 = tpu.matmul %122, %120, %cst_62 {dimension_numbers = #tpu.dot_dimension_numbers<[1], [0], [0], [1], [0, 0, 1, 1], [], []>} : vector<4x4xbf16>, vector<4x288xbf16>, vector<4x288xf32> -> vector<4x288xf32>
      %124 = arith.addf %118, %123 : vector<4x288xf32>
      %c0_63 = arith.constant 0 : index
      %c146_64 = arith.constant 146 : index
      %125 = vector.load %arg6[%c0_63, %c146_64] : memref<4x451xf32, #tpu.memory_space<vmem>>, vector<4x288xf32>
      %126 = arith.truncf %125 : vector<4x288xf32> to vector<4x288xbf16>
      %127 = vector.extract_strided_slice %11 {offsets = [16, 0, 0], sizes = [1, 4, 4], strides = [1, 1, 1]} : vector<18x4x4xbf16> to vector<1x4x4xbf16>
      %128 = vector.shape_cast %127 : vector<1x4x4xbf16> to vector<4x4xbf16>
      %cst_65 = arith.constant dense<0.000000e+00> : vector<4x288xf32>
      %129 = tpu.matmul %128, %126, %cst_65 {dimension_numbers = #tpu.dot_dimension_numbers<[1], [0], [0], [1], [0, 0, 1, 1], [], []>} : vector<4x4xbf16>, vector<4x288xbf16>, vector<4x288xf32> -> vector<4x288xf32>
      %130 = arith.addf %124, %129 : vector<4x288xf32>
      %c0_66 = arith.constant 0 : index
      %c147_67 = arith.constant 147 : index
      %131 = vector.load %arg6[%c0_66, %c147_67] : memref<4x451xf32, #tpu.memory_space<vmem>>, vector<4x288xf32>
      %132 = arith.truncf %131 : vector<4x288xf32> to vector<4x288xbf16>
      %133 = vector.extract_strided_slice %11 {offsets = [17, 0, 0], sizes = [1, 4, 4], strides = [1, 1, 1]} : vector<18x4x4xbf16> to vector<1x4x4xbf16>
      %134 = vector.shape_cast %133 : vector<1x4x4xbf16> to vector<4x4xbf16>
      %cst_68 = arith.constant dense<0.000000e+00> : vector<4x288xf32>
      %135 = tpu.matmul %134, %132, %cst_68 {dimension_numbers = #tpu.dot_dimension_numbers<[1], [0], [0], [1], [0, 0, 1, 1], [], []>} : vector<4x4xbf16>, vector<4x288xbf16>, vector<4x288xf32> -> vector<4x288xf32>
      %136 = arith.addf %130, %135 : vector<4x288xf32>
      %137 = vector.broadcast %81 : vector<4x1xf32> to vector<4x288xf32>
      %138 = arith.addf %136, %137 : vector<4x288xf32>
      %cst_69 = arith.constant 0.000000e+00 : f32
      %139 = vector.broadcast %cst_69 : f32 to vector<4x288xf32>
      %140 = arith.maximumf %138, %139 : vector<4x288xf32>
      %141 = arith.addf %15, %140 : vector<4x288xf32>
      %142 = vector.broadcast %0 : vector<1x288xf32> to vector<4x288xf32>
      %143 = arith.mulf %141, %142 : vector<4x288xf32>
      %c0_70 = arith.constant 0 : index
      %c128_71 = arith.constant 128 : index
      %144 = vector.load %arg6[%c0_70, %c128_71] : memref<4x451xf32, #tpu.memory_space<vmem>>, vector<4x288xf32>
      tpu.vector_store %arg6[%c0_70, %c128_71], %143 {strides = array<i32>} : memref<4x451xf32, #tpu.memory_space<vmem>>, vector<4x288xf32>,
    }
    %c2_i32_6 = arith.constant 2 : i32
    %c0_7 = arith.constant 0 : index
    %c128 = arith.constant 128 : index
    %5 = vector.load %arg6[%c0_7, %c128] : memref<4x451xf32, #tpu.memory_space<vmem>>, vector<4x288xf32>
    %c0_8 = arith.constant 0 : index
    %c0_9 = arith.constant 0 : index
    %c0_10 = arith.constant 0 : index
    %6 = vector.load %arg5[%c0_8, %c0_9, %c0_10] : memref<1x4x288xf32, #tpu.memory_space<vmem>>, vector<1x4x288xf32>
    %7 = vector.shape_cast %6 : vector<1x4x288xf32> to vector<4x288xf32>
    %8 = vector.shape_cast %5 : vector<4x288xf32> to vector<1x4x288xf32>
    tpu.vector_store %arg5[%c0_8, %c0_9, %c0_10], %8 {strides = array<i32>} : memref<1x4x288xf32, #tpu.memory_space<vmem>>, vector<1x4x288xf32>,
    return
  }
  func.func @transform_0(%arg0: i32) -> (i32, i32, i32) {
    %c0_i32 = arith.constant 0 : i32
    %c0_i32_0 = arith.constant 0 : i32
    %c0_i32_1 = arith.constant 0 : i32
    return %arg0, %c0_i32, %c0_i32_0 : i32, i32, i32
  }
  func.func @transform_1(%arg0: i32) -> (i32, i32, i32, i32) {
    %c0_i32 = arith.constant 0 : i32
    %c0_i32_0 = arith.constant 0 : i32
    %c0_i32_1 = arith.constant 0 : i32
    %c0_i32_2 = arith.constant 0 : i32
    %c0_i32_3 = arith.constant 0 : i32
    return %c0_i32, %c0_i32_0, %c0_i32_1, %c0_i32_2 : i32, i32, i32, i32
  }
  func.func @transform_2(%arg0: i32) -> (i32, i32, i32, i32) {
    %c0_i32 = arith.constant 0 : i32
    %c0_i32_0 = arith.constant 0 : i32
    %c0_i32_1 = arith.constant 0 : i32
    %c0_i32_2 = arith.constant 0 : i32
    %c0_i32_3 = arith.constant 0 : i32
    return %c0_i32, %c0_i32_0, %c0_i32_1, %c0_i32_2 : i32, i32, i32, i32
  }
  func.func @transform_3(%arg0: i32) -> (i32, i32) {
    %c0_i32 = arith.constant 0 : i32
    %c0_i32_0 = arith.constant 0 : i32
    %c0_i32_1 = arith.constant 0 : i32
    return %c0_i32, %c0_i32_0 : i32, i32
  }
  func.func @transform_4(%arg0: i32) -> (i32, i32, i32) {
    %c0_i32 = arith.constant 0 : i32
    %c0_i32_0 = arith.constant 0 : i32
    %c0_i32_1 = arith.constant 0 : i32
    return %arg0, %c0_i32, %c0_i32_0 : i32, i32, i32
  }
}

</mosaic_0001>

<bundles_post_ra>
// kernel: nbc_forward_nchw.1
= control target key start
LH: loop header
LB: loop body
LE: loop exit
PB: predicated region body
PF: predicated region fallthrough
CT: control target
= control target key end

     0   :  { %s2744_s15 = smov 0   ;;  %s3127_s0 = inlined_call_operand.vmem [shape: f32[2,4,451], index: 0, kind: input, shape index: {}]   ;;  %s3128_s1 = inlined_call_operand.vmem [shape: bf16[2,18,4,4], index: 1, kind: input, shape index: {}]   ;;  %s3129_s2 = inlined_call_operand.vmem [shape: f32[2,2,4,1], index: 2, kind: input, shape index: {}]   ;;  %s3130_s3 = inlined_call_operand.vmem [shape: f32[1,288], index: 3, kind: input, shape index: {}]   ;;  %s3131_s4 = inlined_call_operand.vmem [shape: f32[2,4,288], index: 4, kind: output, shape index: {}]  }
   0x1 LB: > { %s2445_s16 = sadd.s32 4294967295, %s2702_s15   ;;  %p2449_p0 = scmp.ge.s32.totalorder %s2702_s15, 1  ;;  %s2702_s15 = sphi %s2744_s15, %s14_s15  }
   0x2   : > { %p162_p1 = scmp.lt.s32.totalorder %s2702_s15, 3 }
   0x4   : > { %p163_p2 = pnand %p2449_p0, %p162_p1 }
   0x5   : > { %p188_p3 = scmp.lt.s32.totalorder (!%p163_p2), %s2445_s16, 1  ;;  %s2765_s27 = smov (!%p163_p2), 0  }
   0x6   : > { %166 = sbr.rel (%p163_p2) target bundleno = 832 (0x340), region = 36 }
   0xb   : > { %v2755_v0 = vld [vmem:[%s3130_s3] sm:$0x7]  ;;  %vm203_vm0 = vcmask 1043456   ;;  %vm204_vm1 = vcmask 547844   ;;  %s3133_s16 = smov (!%p188_p3, %s2445_s16), 1 }
   0xc   : > { %s2511_s19 = sshll.u32 %s3133_s16, 4  ;;  %s2657_s20 = smul.u32 12, %s3133_s16  ;;  %vm205_vm2 = vmor %vm204_vm1, %vm203_vm0 }
   0xd   : > { %s192_s23 = scalar_lea.vmem %s3127_s0, %s2511_s19 }
   0xe   : > { %s2763_s26 = scalar_lea.vmem %s3131_s4, %s2657_s20  ;;  %v200_v1 = vld [vmem:[%s192_s23] sm:$0xff]  ;;  %v201_v2 = vld [vmem:[%s192_s23 + $0x8] sm:$0xff] }
   0xf   : > { %202 = vst [vmem:[#allocation2] sm:$0xff] %v200_v1  ;;  %206 = vst.msk [vmem:[#allocation2 + $0x8] sm:$0xff] %vm205_vm2, %v201_v2 }
  0x10 LB: >> { %s2708_s28 = smov 18   ;;  %v2709_v11 = vmov 0.0   ;;  %v2710_v12 = vmov 0   ;;  %vm2711_vm3 = vmmov 0   ;;  %s2712_s29 = smov 19   ;;  %vm264_vm4 = vcmask 146432   ;;  %s2706_s27 = sphi %s2765_s27, %s212_s27  }
  0x11   : >> { %2549 = vmatprep.subr.bf16.mxu1 %v2709_v11  ;;  %314 = vmatprep.mubr.bf16.mxu0 %v2710_v12  ;;  %s2713_s30 = smov 17   ;;  %s2714_s5 = smov 1   ;;  %vm272_vm5 = vcmask 1041408   ;;  %vm268_vm6 = vcmask 31744   ;;  %vm371_vm7 = vcmask 154624   ;;  %vm492_vm8 = vcmask 138240  }
  0x12   : >> { %2551 = vmatprep.mubr.msk.bf16.mxu1 %vm2711_vm3, %v2709_v11  ;;  %2685 = vset.pattern.permute.xlu0 %v2710_v12  ;;  %s2715_s6 = smov 127   ;;  %s2716_s7 = smov 111   ;;  %vm616_vm9 = vcmask 7168   ;;  %vm835_vm10 = vcmask 1039360   ;;  %vm951_vm11 = vcmask 908288   ;;  %vm1067_vm12 = vcmask 900096  }
  0x13   : >> { %s2717_s8 = smov 110   ;;  %s2718_s9 = smov 109   ;;  %vm1183_vm13 = vcmask 891904   ;;  %vm1317_vm14 = vcmask 257024  }
  0x14   : >> { %s2454_s10 = sshll.u32 %s2706_s27, 3  ;;  %s2512_s14 = smul.u32 36, %s2706_s27 }
  0x15   : >> { %s2825_s13 = scalar_lea.vmem %s3129_s2, %s2454_s10  ;;  %s212_s27 = sadd.s32 1, %s2706_s27  }
  0x16   : >> { %v241_v3 = vld [vmem:[#allocation2 + $0x8] sm:$0xff]  ;;  %v240_v4 = vld [vmem:[#allocation2] sm:$0xff]  ;;  %s2832_s18 = scalar_lea.vmem %s3128_s1, %s2512_s14  ;;  %p209_p4 = scmp.ge.s32.totalorder %s212_s27, 2  }
  0x17   : >> { %v250_v5 = vpack.c.bf16 %v241_v3, %v241_v3  ;;  %v248_v6 = vpack.c.bf16 %v240_v4, %v240_v4  ;;  %v245_v7 = vcombine.high %v241_v3, %v241_v3  ;;  %v244_v8 = vcombine.high %v240_v4, %v240_v4  ;;  %v2787_v13 = vld [vmem:[#allocation2 + $0x4] sm:$0xff]  ;;  %v819_v17 = vld [vmem:[#allocation2 + $0xc] sm:$0xf]  ;;  %v236_v25 = vld [vmem:[%s2825_s13] sm:$0xf] }
  0x18   : >> { %v821_v14 = vcombine.high %v2787_v13, %v2787_v13  ;;  %v2797_v15 = vpack.c.bf16 %v2787_v13, %v2787_v13  ;;  %v825_v18 = vpack.c.bf16 %v819_v17, %v819_v17  ;;  %v935_v19 = vld [vmem:[#allocation2 + $0xc] sm:$0xf]  ;;  %v217_v35 = vld [vmem:[%s2832_s18 + $0x2] sm:$0x3]  ;;  %v216_v45 = vld [vmem:[%s2832_s18] sm:$0x3] }
  0x19   : >> { %260 = vrot.lane.b32.xlu1 %v250_v5, %s2708_s28  ;;  %256 = vrot.lane.b32.xlu0 %v248_v6, %s2708_s28  ;;  %v251_v9 = vpack.c.bf16 %v245_v7, %v245_v7  ;;  %v249_v10 = vpack.c.bf16 %v244_v8, %v244_v8  ;;  %v941_v20 = vpack.c.bf16 %v935_v19, %v935_v19  ;;  %v1051_v21 = vld [vmem:[#allocation2 + $0xc] sm:$0xf]  ;;  %v218_v55 = vld [vmem:[%s2832_s18 + $0x4] sm:$0x3]  ;;  %v219_v4 = vld [vmem:[%s2832_s18 + $0x6] sm:$0x3] }
  0x1a   : >> { %v2799_v16 = vpack.c.bf16 %v821_v14, %v821_v14  ;;  %v1057_v22 = vpack.c.bf16 %v1051_v21, %v1051_v21  ;;  %v1167_v23 = vld [vmem:[#allocation2 + $0xc] sm:$0xf] }
  0x1b   : >> { %v1173_v24 = vpack.c.bf16 %v1167_v23, %v1167_v23  ;;  %v2868_v58 = vld [vmem:[#allocation2 + $0xc] sm:$0xf] }
  0x1c   : >> { %v721_v62 = vpack.c.bf16 %v2868_v58, %v2868_v58 }
  0x1d   : >> { %262 = vrot.lane.b32.xlu1 %v251_v9, %s2708_s28  ;;  %258 = vrot.lane.b32.xlu0 %v249_v10, %s2708_s28 }
  0x1e   : >> { %v732_v7 = vsel %vm272_vm5, %v721_v62, 0 }
  0x21   : >> { %365 = vrot.lane.b32.xlu1 %v249_v10, %s2712_s29  ;;  %363 = vrot.lane.b32.xlu0 %v248_v6, %s2712_s29 }
  0x25   : >> { %369 = vrot.lane.b32.xlu1 %v251_v9, %s2712_s29  ;;  %367 = vrot.lane.b32.xlu0 %v250_v5, %s2712_s29 }
  0x29   : >> { %486 = vrot.lane.b32.xlu1 %v249_v10, %s2713_s30  ;;  %484 = vrot.lane.b32.xlu0 %v248_v6, %s2713_s30 }
  0x2d   : >> { %490 = vrot.lane.b32.xlu1 %v251_v9, %s2713_s30  ;;  %488 = vrot.lane.b32.xlu0 %v250_v5, %s2713_s30 }
  0x31   : >> { %610 = vrot.lane.b32.xlu1 %v249_v10, %s2714_s5  ;;  %608 = vrot.lane.b32.xlu0 %v248_v6, %s2714_s5  ;;  %v726_v6 = vsel %vm272_vm5, %v2797_v15, 0 }
  0x35   : >> { %614 = vrot.lane.b32.xlu1 %v251_v9, %s2714_s5  ;;  %612 = vrot.lane.b32.xlu0 %v250_v5, %s2714_s5 }
  0x39   : >> { %829 = vrot.lane.b32.xlu0 %v2797_v15, %s2715_s6  ;;  %831 = vrot.lane.b32.xlu1 %v2799_v16, %s2715_s6 }
  0x3d   : >> { %833 = vrot.lane.b32.xlu0 %v825_v18, %s2715_s6  ;;  %945 = vrot.lane.b32.xlu1 %v2797_v15, %s2716_s7 }
  0x41   : >> { %949 = vrot.lane.b32.xlu1 %v941_v20, %s2716_s7  ;;  %947 = vrot.lane.b32.xlu0 %v2799_v16, %s2716_s7 }
  0x45   : >> { %1061 = vrot.lane.b32.xlu0 %v2797_v15, %s2717_s8  ;;  %1063 = vrot.lane.b32.xlu1 %v2799_v16, %s2717_s8 }
  0x49   : >> { %1065 = vrot.lane.b32.xlu0 %v1057_v22, %s2717_s8  ;;  %1177 = vrot.lane.b32.xlu1 %v2797_v15, %s2718_s9 }
  0x4d   : >> { %1181 = vrot.lane.b32.xlu1 %v1173_v24, %s2718_s9  ;;  %1179 = vrot.lane.b32.xlu0 %v2799_v16, %s2718_s9 }
  0x51   : >> { %1284 = vperm.xlu0 %2685, %v236_v25   ;;  %v221_v25 = vld [vmem:[%s2832_s18 + $0xa] sm:$0x3] }
  0x8b   : >> { %v261_v26 = vpop.permute.xlu1 %260  ;;  %v257_v27 = vpop.permute.xlu0 %256 }
  0x8f   : >> { %v263_v28 = vpop.permute.xlu1 %262  ;;  %v259_v29 = vpop.permute.xlu0 %258 }
  0x90   : >> { %v266_v30 = vsel %vm264_vm4, %v259_v29, %v261_v26  ;;  %v265_v31 = vsel %vm264_vm4, %v257_v27, %v259_v29  ;;  %v267_v32 = vsel %vm264_vm4, %v261_v26, %v263_v28 }
  0x91   : >> { %2455 = vmatprep.subr.msk.bf16.mxu0 %vm272_vm5, %v266_v30  ;;  %v274_v33 = vsel %vm272_vm5, %v265_v31, 0  ;;  %v280_v34 = vsel %vm272_vm5, %v267_v32, 0  ;;  %v222_v32 = vld [vmem:[%s2832_s18 + $0xc] sm:$0x3] }
  0x92   : >> { %297 = vmatpush1.bf16.msra.mxu0 %v274_v33  ;;  %2550 = vmatpush3.bf16.msra.mxu1 %v280_v34 }
  0x93   : >> { %v366_v36 = vpop.permute.xlu1 %365  ;;  %v364_v37 = vpop.permute.xlu0 %363  ;;  %2555 = vmatprep.subr.bf16.mxu1 %v2709_v11 }
  0x94   : >> { %v372_v38 = vsel %vm371_vm7, %v364_v37, %v366_v36 }
  0x95   : >> { %2456 = vmatmul.mubr.msk.bf16.vlgmr.msra.gmra.mxu0 %vm268_vm6, %v217_v35  ;;  %2552 = vmatmul.mubr.msk.bf16.vlgmr.msra.gmra.mxu1 %vm268_vm6, %v217_v35  ;;  %v379_v43 = vsel %vm272_vm5, %v372_v38, 0 }
  0x96   : >> { %419 = vmatprep.mubr.bf16.mxu0 %v2710_v12  ;;  %2557 = vmatprep.mubr.msk.bf16.mxu1 %vm2711_vm3, %v2709_v11 }
  0x97   : >> { %v370_v39 = vpop.permute.xlu1 %369  ;;  %v368_v40 = vpop.permute.xlu0 %367 }
  0x98   : >> { %v373_v41 = vsel %vm371_vm7, %v366_v36, %v368_v40  ;;  %v374_v42 = vsel %vm371_vm7, %v368_v40, %v370_v39  ;;  %v223_v39 = vld [vmem:[%s2832_s18 + $0xe] sm:$0x3] }
  0x99   : >> { %v385_v44 = vsel %vm272_vm5, %v374_v42, 0  ;;  %2458 = vmatprep.subr.msk.bf16.mxu0 %vm272_vm5, %v373_v41  ;;  %v224_v42 = vld [vmem:[%s2832_s18 + $0x10] sm:$0x3] }
  0x9a   : >> { %402 = vmatpush1.bf16.msra.mxu0 %v379_v43  ;;  %2556 = vmatpush3.bf16.msra.mxu1 %v385_v44 }
  0x9b   : >> { %v487_v46 = vpop.permute.xlu1 %486  ;;  %v485_v47 = vpop.permute.xlu0 %484  ;;  %2561 = vmatprep.subr.bf16.mxu1 %v2709_v11 }
  0x9c   : >> { %v493_v48 = vsel %vm492_vm8, %v485_v47, %v487_v46 }
  0x9d   : >> { %2459 = vmatmul.mubr.msk.bf16.vlgmr.msra.gmra.mxu0 %vm268_vm6, %v216_v45  ;;  %2558 = vmatmul.mubr.msk.bf16.vlgmr.msra.gmra.mxu1 %vm268_vm6, %v216_v45  ;;  %v500_v53 = vsel %vm272_vm5, %v493_v48, 0 }
  0x9e   : >> { %540 = vmatprep.mubr.bf16.mxu0 %v2710_v12  ;;  %2563 = vmatprep.mubr.msk.bf16.mxu1 %vm2711_vm3, %v2709_v11 }
  0x9f   : >> { %v491_v49 = vpop.permute.xlu1 %490  ;;  %v489_v50 = vpop.permute.xlu0 %488 }
  0xa0   : >> { %v494_v51 = vsel %vm492_vm8, %v487_v46, %v489_v50  ;;  %v495_v52 = vsel %vm492_vm8, %v489_v50, %v491_v49 }
  0xa1   : >> { %v506_v54 = vsel %vm272_vm5, %v495_v52, 0  ;;  %2461 = vmatprep.subr.msk.bf16.mxu0 %vm272_vm5, %v494_v51 }
  0xa2   : >> { %523 = vmatpush1.bf16.msra.mxu0 %v500_v53  ;;  %2562 = vmatpush3.bf16.msra.mxu1 %v506_v54 }
  0xa3   : >> { %v611_v56 = vpop.permute.xlu1 %610  ;;  %v609_v57 = vpop.permute.xlu0 %608  ;;  %2567 = vmatprep.subr.bf16.mxu1 %v2709_v11 }
  0xa4   : >> { %v617_v59 = vsel %vm616_vm9, %v609_v57, %v611_v56 }
  0xa5   : >> { %2462 = vmatmul.mubr.msk.bf16.vlgmr.msra.gmra.mxu0 %vm268_vm6, %v218_v55  ;;  %2564 = vmatmul.mubr.msk.bf16.vlgmr.msra.gmra.mxu1 %vm268_vm6, %v218_v55  ;;  %v624_v2 = vsel %vm272_vm5, %v617_v59, 0 }
  0xa6   : >> { %664 = vmatprep.mubr.bf16.mxu0 %v2710_v12  ;;  %2569 = vmatprep.mubr.msk.bf16.mxu1 %vm2711_vm3, %v2709_v11 }
  0xa7   : >> { %v615_v60 = vpop.permute.xlu1 %614  ;;  %v613_v61 = vpop.permute.xlu0 %612 }
  0xa8   : >> { %v618_v63 = vsel %vm616_vm9, %v611_v56, %v613_v61  ;;  %v619_v1 = vsel %vm616_vm9, %v613_v61, %v615_v60 }
  0xa9   : >> { %v630_v3 = vsel %vm272_vm5, %v619_v1, 0  ;;  %2464 = vmatprep.subr.msk.bf16.mxu0 %vm272_vm5, %v618_v63 }
  0xaa   : >> { %647 = vmatpush1.bf16.msra.mxu0 %v624_v2  ;;  %2568 = vmatpush3.bf16.msra.mxu1 %v630_v3 }
  0xab   : >> { %v830_v5 = vpop.permute.xlu0 %829  ;;  %2467 = vmatprep.subr.msk.bf16.mxu0 %vm272_vm5, %v2799_v16  ;;  %2573 = vmatprep.subr.bf16.mxu1 %v2709_v11  ;;  %v832_v8 = vpop.permute.xlu1 %831  ;;  %v220_v16 = vld [vmem:[%s2832_s18 + $0x8] sm:$0x3] }
  0xac   : >> { %v836_v14 = vsel %vm835_vm10, %v830_v5, %v832_v8 }
  0xad   : >> { %2465 = vmatmul.mubr.msk.bf16.vlgmr.msra.gmra.mxu0 %vm268_vm6, %v219_v4  ;;  %2570 = vmatmul.mubr.msk.bf16.vlgmr.msra.gmra.mxu1 %vm268_vm6, %v219_v4  ;;  %v842_v17 = vsel %vm272_vm5, %v836_v14, 0 }
  0xae   : >> { %749 = vmatpush1.bf16.msra.mxu0 %v726_v6  ;;  %2574 = vmatpush3.bf16.msra.mxu1 %v732_v7 }
  0xaf   : >> { %v834_v9 = vpop.permute.xlu0 %833  ;;  %766 = vmatprep.mubr.bf16.mxu0 %v2710_v12  ;;  %2575 = vmatprep.mubr.msk.bf16.mxu1 %vm2711_vm3, %v2709_v11  ;;  %v946_v10 = vpop.permute.xlu1 %945 }
  0xb0   : >> { %v837_v15 = vsel %vm835_vm10, %v832_v8, %v834_v9  ;;  %2579 = vmatprep.subr.bf16.mxu1 %v2709_v11  ;;  %v848_v18 = vsel %vm272_vm5, %v834_v9, 0 }
  0xb1   : >> { %2470 = vmatprep.subr.msk.bf16.mxu0 %vm272_vm5, %v837_v15 }
  0xb3   : >> { %v950_v19 = vpop.permute.xlu1 %949  ;;  %v948_v20 = vpop.permute.xlu0 %947 }
  0xb4   : >> { %v953_v21 = vsel %vm951_vm11, %v948_v20, %v950_v19  ;;  %v952_v24 = vsel %vm951_vm11, %v946_v10, %v948_v20  ;;  %v964_v26 = vsel %vm272_vm5, %v950_v19, 0 }
  0xb5   : >> { %2468 = vmatmul.mubr.msk.bf16.vlgmr.msra.gmra.mxu0 %vm268_vm6, %v220_v16  ;;  %2576 = vmatmul.mubr.msk.bf16.vlgmr.msra.gmra.mxu1 %vm268_vm6, %v220_v16  ;;  %v958_v27 = vsel %vm272_vm5, %v952_v24, 0 }
  0xb6   : >> { %865 = vmatpush1.bf16.msra.mxu0 %v842_v17  ;;  %2580 = vmatpush3.bf16.msra.mxu1 %v848_v18 }
  0xb7   : >> { %882 = vmatprep.mubr.bf16.mxu0 %v2710_v12  ;;  %2581 = vmatprep.mubr.msk.bf16.mxu1 %vm2711_vm3, %v2709_v11  ;;  %v1062_v22 = vpop.permute.xlu0 %1061  ;;  %v1064_v23 = vpop.permute.xlu1 %1063 }
  0xb8   : >> { %2473 = vmatprep.subr.msk.bf16.mxu0 %vm272_vm5, %v953_v21  ;;  %2585 = vmatprep.subr.bf16.mxu1 %v2709_v11  ;;  %v1068_v31 = vsel %vm1067_vm12, %v1062_v22, %v1064_v23 }
  0xb9   : >> { %v1074_v35 = vsel %vm272_vm5, %v1068_v31, 0 }
  0xbb   : >> { %v1066_v28 = vpop.permute.xlu0 %1065  ;;  %v1178_v29 = vpop.permute.xlu1 %1177 }
  0xbc   : >> { %v1069_v30 = vsel %vm1067_vm12, %v1064_v23, %v1066_v28  ;;  %v1080_v36 = vsel %vm272_vm5, %v1066_v28, 0 }
  0xbd   : >> { %2471 = vmatmul.mubr.msk.bf16.vlgmr.msra.gmra.mxu0 %vm268_vm6, %v221_v25  ;;  %2582 = vmatmul.mubr.msk.bf16.vlgmr.msra.gmra.mxu1 %vm268_vm6, %v221_v25 }
  0xbe   : >> { %981 = vmatpush1.bf16.msra.mxu0 %v958_v27  ;;  %2586 = vmatpush3.bf16.msra.mxu1 %v964_v26 }
  0xbf   : >> { %998 = vmatprep.mubr.bf16.mxu0 %v2710_v12  ;;  %2587 = vmatprep.mubr.msk.bf16.mxu1 %vm2711_vm3, %v2709_v11  ;;  %v1182_v33 = vpop.permute.xlu1 %1181  ;;  %v1180_v34 = vpop.permute.xlu0 %1179 }
  0xc0   : >> { %2476 = vmatprep.subr.msk.bf16.mxu0 %vm272_vm5, %v1069_v30  ;;  %2591 = vmatprep.subr.bf16.mxu1 %v2709_v11  ;;  %v1185_v37 = vsel %vm1183_vm13, %v1180_v34, %v1182_v33  ;;  %v1184_v38 = vsel %vm1183_vm13, %v1178_v29, %v1180_v34  ;;  %v1196_v40 = vsel %vm272_vm5, %v1182_v33, 0 }
  0xc1   : >> { %v1190_v41 = vsel %vm272_vm5, %v1184_v38, 0 }
  0xc5   : >> { %2474 = vmatmul.mubr.msk.bf16.vlgmr.msra.gmra.mxu0 %vm268_vm6, %v222_v32  ;;  %2588 = vmatmul.mubr.msk.bf16.vlgmr.msra.gmra.mxu1 %vm268_vm6, %v222_v32 }
  0xc6   : >> { %1097 = vmatpush1.bf16.msra.mxu0 %v1074_v35  ;;  %2592 = vmatpush3.bf16.msra.mxu1 %v1080_v36 }
  0xc7   : >> { %1114 = vmatprep.mubr.bf16.mxu0 %v2710_v12  ;;  %2593 = vmatprep.mubr.msk.bf16.mxu1 %vm2711_vm3, %v2709_v11 }
  0xc8   : >> { %2479 = vmatprep.subr.msk.bf16.mxu0 %vm272_vm5, %v1185_v37  ;;  %2597 = vmatprep.subr.bf16.mxu1 %v2709_v11 }
  0xcd   : >> { %2477 = vmatmul.mubr.msk.bf16.vlgmr.msra.gmra.mxu0 %vm268_vm6, %v223_v39  ;;  %2594 = vmatmul.mubr.msk.bf16.vlgmr.msra.gmra.mxu1 %vm268_vm6, %v223_v39 }
  0xce   : >> { %1213 = vmatpush1.bf16.msra.mxu0 %v1190_v41  ;;  %2598 = vmatpush3.bf16.msra.mxu1 %v1196_v40 }
  0xcf   : >> { %1230 = vmatprep.mubr.bf16.mxu0 %v2710_v12  ;;  %2599 = vmatprep.mubr.msk.bf16.mxu1 %vm2711_vm3, %v2709_v11 }
  0xd0   : >> { %2603 = vmatprep.subr.bf16.mxu1 %v2709_v11 }
  0xd5   : >> { %2480 = vmatmul.mubr.msk.bf16.vlgmr.msra.gmra.mxu0 %vm268_vm6, %v224_v42  ;;  %2600 = vmatmul.mubr.msk.bf16.vlgmr.msra.gmra.mxu1 %vm268_vm6, %v224_v42 }
  0xd6   : >> { %1390 = vmatprep.mubr.bf16.mxu0 %v2710_v12  ;;  %2605 = vmatprep.mubr.msk.bf16.mxu1 %vm2711_vm3, %v2709_v11 }
 0x155   : >> { %v316_v43 = vpop.f32.mrf.mxu0  ;;  %v357_v44 = vpop.f32.mrf.mxu1 }
 0x157   : >> { %v318_v45 = vpop.f32.mrf.mxu0  ;;  %v2553_v46 = vpop.f32.mrf.mxu1 }
 0x159   : >> { %v320_v47 = vpop.f32.mrf.mxu0  ;;  %v360_v48 = vpop.f32.mrf.mxu1 }
 0x15b   : >> { %v321_v49 = vpop.f32.mrf.mxu0  ;;  %v2554_v50 = vpop.f32.mrf.mxu1 }
 0x15d   : >> { %v421_v51 = vpop.f32.mrf.mxu0  ;;  %v462_v52 = vpop.f32.mrf.mxu1 }
 0x15e   : >> { %v422_v36 = vadd.f32 %v421_v51, %v316_v43  ;;  %v463_v37 = vadd.f32 %v462_v52, %v357_v44 }
 0x15f   : >> { %v423_v53 = vpop.f32.mrf.mxu0  ;;  %v2559_v54 = vpop.f32.mrf.mxu1 }
 0x160   : >> { %v424_v40 = vadd.f32 %v423_v53, %v318_v45  ;;  %v1294_v54 = vlaneseq }
 0x161   : >> { %v425_v55 = vpop.f32.mrf.mxu0  ;;  %v465_v56 = vpop.f32.mrf.mxu1 }
 0x162   : >> { %v1295_v52 = vshrl.u32 %v1294_v54, 7 }
 0x163   : >> { %v426_v57 = vpop.f32.mrf.mxu0  ;;  %v2560_v59 = vpop.f32.mrf.mxu1 }
 0x165   : >> { %v542_v60 = vpop.f32.mrf.mxu0  ;;  %v583_v61 = vpop.f32.mrf.mxu1 }
 0x166   : >> { %v589_v41 = vadd.f32 %v542_v60, %v422_v36  ;;  %v591_v42 = vadd.f32 %v583_v61, %v463_v37 }
 0x167   : >> { %v544_v62 = vpop.f32.mrf.mxu0  ;;  %v2565_v63 = vpop.f32.mrf.mxu1 }
 0x168   : >> { %v590_v48 = vadd.f32 %v544_v62, %v424_v40 }
 0x169   : >> { %v546_v1 = vpop.f32.mrf.mxu0  ;;  %v586_v2 = vpop.f32.mrf.mxu1 }
 0x16b   : >> { %v547_v3 = vpop.f32.mrf.mxu0  ;;  %v2566_v4 = vpop.f32.mrf.mxu1 }
 0x16d   : >> { %v666_v5 = vpop.f32.mrf.mxu0  ;;  %v707_v6 = vpop.f32.mrf.mxu1 }
 0x16e   : >> { %v713_v49 = vadd.f32 %v666_v5, %v589_v41  ;;  %v715_v50 = vadd.f32 %v707_v6, %v591_v42 }
 0x16f   : >> { %v668_v7 = vpop.f32.mrf.mxu0  ;;  %v2571_v8 = vpop.f32.mrf.mxu1 }
 0x170   : >> { %v714_v57 = vadd.f32 %v668_v7, %v590_v48  ;;  %v1285_v7 = vpop.permute.xlu0 %1284 }
 0x171   : >> { %v670_v9 = vpop.f32.mrf.mxu0  ;;  %v710_v10 = vpop.f32.mrf.mxu1 }
 0x172   : >> { %v1304_v9 = vsub.s32 2, %v1295_v52 }
 0x173   : >> { %v671_v14 = vpop.f32.mrf.mxu0  ;;  %v2572_v15 = vpop.f32.mrf.mxu1 }
 0x174   : >> { %v1296_v15 = vsub.s32 0, %v1295_v52 }
 0x175   : >> { %v768_v16 = vpop.f32.mrf.mxu0  ;;  %v809_v17 = vpop.f32.mrf.mxu1 }
 0x176   : >> { %v815_v59 = vadd.f32 %v768_v16, %v713_v49  ;;  %v817_v63 = vadd.f32 %v809_v17, %v715_v50 }
 0x177   : >> { %v770_v18 = vpop.f32.mrf.mxu0  ;;  %v2577_v19 = vpop.f32.mrf.mxu1 }
 0x178   : >> { %v816_v43 = vadd.f32 %v770_v18, %v714_v57  ;;  %v1300_v19 = vsub.s32 1, %v1295_v52 }
 0x179   : >> { %v772_v20 = vpop.f32.mrf.mxu0  ;;  %v812_v21 = vpop.f32.mrf.mxu1 }
 0x17b   : >> { %v773_v22 = vpop.f32.mrf.mxu0  ;;  %v2578_v23 = vpop.f32.mrf.mxu1 }
 0x17c   : >> { %v2951_v22 = vrot.slane %v2755_v0, %v1304_v9 }
 0x17d   : >> { %v884_v24 = vpop.f32.mrf.mxu0  ;;  %v925_v25 = vpop.f32.mrf.mxu1 }
 0x17e   : >> { %v931_v44 = vadd.f32 %v884_v24, %v815_v59  ;;  %v933_v51 = vadd.f32 %v925_v25, %v817_v63 }
 0x17f   : >> { %v886_v26 = vpop.f32.mrf.mxu0  ;;  %v2583_v27 = vpop.f32.mrf.mxu1 }
 0x180   : >> { %v932_v60 = vadd.f32 %v886_v26, %v816_v43  ;;  %v2954_v26 = vrot.slane %v2755_v0, %v1296_v15 }
 0x181   : >> { %v888_v28 = vpop.f32.mrf.mxu0  ;;  %v928_v29 = vpop.f32.mrf.mxu1 }
 0x183   : >> { %v889_v30 = vpop.f32.mrf.mxu0  ;;  %v2584_v31 = vpop.f32.mrf.mxu1 }
 0x185   : >> { %v1000_v32 = vpop.f32.mrf.mxu0  ;;  %v1041_v33 = vpop.f32.mrf.mxu1 }
 0x186   : >> { %v1047_v61 = vadd.f32 %v1000_v32, %v931_v44  ;;  %v1049_v3 = vadd.f32 %v1041_v33, %v933_v51  ;;  %v2957_v32 = vrot.slane %v2755_v0, %v1300_v19  ;;  %v237_v44 = vld [vmem:[%s2825_s13 + $0x4] sm:$0xf] }
 0x187   : >> { %v1002_v34 = vpop.f32.mrf.mxu0  ;;  %v2589_v35 = vpop.f32.mrf.mxu1 }
 0x188   : >> { %v1048_v5 = vadd.f32 %v1002_v34, %v932_v60 }
 0x189   : >> { %v1004_v38 = vpop.f32.mrf.mxu0  ;;  %v1044_v39 = vpop.f32.mrf.mxu1 }
 0x18b   : >> { %v1005_v46 = vpop.f32.mrf.mxu0  ;;  %v2590_v47 = vpop.f32.mrf.mxu1 }
 0x18d   : >> { %v1116_v55 = vpop.f32.mrf.mxu0  ;;  %v1157_v56 = vpop.f32.mrf.mxu1 }
 0x18e   : >> { %v1163_v6 = vadd.f32 %v1116_v55, %v1047_v61  ;;  %v1165_v8 = vadd.f32 %v1157_v56, %v1049_v3 }
 0x18f   : >> { %v1118_v1 = vpop.f32.mrf.mxu0  ;;  %v2595_v2 = vpop.f32.mrf.mxu1 }
 0x190   : >> { %v1164_v16 = vadd.f32 %v1118_v1, %v1048_v5  ;;  %v226_v5 = vld [vmem:[%s2832_s18 + $0x14] sm:$0x3] }
 0x191   : >> { %v1120_v45 = vpop.f32.mrf.mxu0  ;;  %v1160_v53 = vpop.f32.mrf.mxu1 }
 0x193   : >> { %v1121_v62 = vpop.f32.mrf.mxu0  ;;  %v2596_v4 = vpop.f32.mrf.mxu1 }
 0x195   : >> { %v1232_v10 = vpop.f32.mrf.mxu0  ;;  %v1273_v14 = vpop.f32.mrf.mxu1 }
 0x196   : >> { %v1279_v17 = vadd.f32 %v1232_v10, %v1163_v6  ;;  %v1281_v18 = vadd.f32 %v1273_v14, %v1165_v8 }
 0x197   : >> { %v1234_v20 = vpop.f32.mrf.mxu0  ;;  %v2601_v21 = vpop.f32.mrf.mxu1 }
 0x198   : >> { %v1287_v23 = vadd.f32 %v1285_v7, %v1279_v17  ;;  %v1289_v24 = vadd.f32 %v1285_v7, %v1281_v18  ;;  %v1280_v25 = vadd.f32 %v1234_v20, %v1164_v16  ;;  %v225_v18 = vld [vmem:[%s2832_s18 + $0x12] sm:$0x3] }
 0x199   : >> { %v1236_v27 = vpop.f32.mrf.mxu0  ;;  %v1276_v28 = vpop.f32.mrf.mxu1 }
 0x19a   : >> { %v1290_v29 = vmax.f32 %v1287_v23, 0.0  ;;  %v1292_v30 = vmax.f32 %v1289_v24, 0.0  ;;  %v1288_v31 = vadd.f32 %v1285_v7, %v1280_v25 }
 0x19b   : >> { %v1237_v33 = vpop.f32.mrf.mxu0  ;;  %v2602_v34 = vpop.f32.mrf.mxu1 }
 0x19c   : >> { %v1311_v35 = vmul.f32 %v2951_v22, %v1292_v30  ;;  %v1291_v36 = vmax.f32 %v1288_v31, 0.0  ;;  %v1309_v37 = vmul.f32 %v2954_v26, %v1290_v29  ;;  %v227_v30 = vld [vmem:[%s2832_s18 + $0x16] sm:$0x3] }
 0x19e   : >> { %v1310_v38 = vmul.f32 %v2957_v32, %v1291_v36  ;;  %1318 = vst.msk [vmem:[#allocation2 + $0xc] sm:$0xf] %vm1317_vm14, %v1311_v35 }
 0x1a0   : >> { %v1314_v39 = vcombine.low %v1309_v37, %v1310_v38  ;;  %v2691_v57 = vcombine.low %v1310_v38, %v1310_v38 }
 0x1a2   : >> { %1316 = vst [vmem:[#allocation2 + $0x4] sm:$0xff] %v1314_v39  ;;  %v2977_v54 = vpack.c.bf16 %v1314_v39, %v1314_v39  ;;  %v2984_v59 = vpack.c.bf16 %v2691_v57, %v2691_v57 }
 0x1a5   : >> { %v1894_v55 = vld [vmem:[#allocation2 + $0xc] sm:$0xf] }
 0x1a6   : >> { %v1900_v56 = vpack.c.bf16 %v1894_v55, %v1894_v55  ;;  %v2124_v63 = vld [vmem:[#allocation2 + $0xc] sm:$0xf] }
 0x1a7   : >> { %v2009_v1 = vld [vmem:[#allocation2 + $0xc] sm:$0xf]  ;;  %v2130_v2 = vpack.c.bf16 %v2124_v63, %v2124_v63 }
 0x1a8   : >> { %v2015_v43 = vpack.c.bf16 %v2009_v1, %v2009_v1  ;;  %v2239_v51 = vld [vmem:[#allocation2 + $0xc] sm:$0xf] }
 0x1a9   : >> { %v1320_v40 = vld [vmem:[#allocation2 + $0x8] sm:$0xff]  ;;  %v1319_v41 = vld [vmem:[#allocation2] sm:$0xff]  ;;  %v2245_v52 = vpack.c.bf16 %v2239_v51, %v2239_v51 }
 0x1aa   : >> { %v1329_v42 = vpack.c.bf16 %v1320_v40, %v1320_v40  ;;  %v1327_v46 = vpack.c.bf16 %v1319_v41, %v1319_v41  ;;  %v1323_v47 = vcombine.high %v1319_v41, %v1319_v41  ;;  %v1324_v49 = vcombine.high %v1320_v40, %v1320_v40  ;;  %v228_v41 = vld [vmem:[%s2832_s18 + $0x18] sm:$0x3] }
 0x1ac   : >> { %1339 = vrot.lane.b32.xlu0 %v1329_v42, %s2708_s28  ;;  %1335 = vrot.lane.b32.xlu1 %v1327_v46, %s2708_s28  ;;  %v1328_v48 = vpack.c.bf16 %v1323_v47, %v1323_v47  ;;  %v1330_v50 = vpack.c.bf16 %v1324_v49, %v1324_v49 }
 0x1b0   : >> { %1439 = vrot.lane.b32.xlu0 %v1327_v46, %s2712_s29  ;;  %1337 = vrot.lane.b32.xlu1 %v1328_v48, %s2708_s28 }
 0x1b4   : >> { %1443 = vrot.lane.b32.xlu0 %v1329_v42, %s2712_s29  ;;  %1341 = vrot.lane.b32.xlu1 %v1330_v50, %s2708_s28 }
 0x1b8   : >> { %1559 = vrot.lane.b32.xlu0 %v1327_v46, %s2713_s30  ;;  %1441 = vrot.lane.b32.xlu1 %v1328_v48, %s2712_s29 }
 0x1bc   : >> { %1563 = vrot.lane.b32.xlu0 %v1329_v42, %s2713_s30  ;;  %1445 = vrot.lane.b32.xlu1 %v1330_v50, %s2712_s29 }
 0x1c0   : >> { %1682 = vrot.lane.b32.xlu0 %v1327_v46, %s2714_s5  ;;  %1561 = vrot.lane.b32.xlu1 %v1328_v48, %s2713_s30 }
 0x1c4   : >> { %1686 = vrot.lane.b32.xlu0 %v1329_v42, %s2714_s5  ;;  %1565 = vrot.lane.b32.xlu1 %v1330_v50, %s2713_s30  ;;  %v1790_v42 = vld [vmem:[#allocation2 + $0xc] sm:$0xf] }
 0x1c5   : >> { %v1796_v55 = vpack.c.bf16 %v1790_v42, %v1790_v42 }
 0x1c7   : >> { %v1807_v63 = vsel %vm272_vm5, %v1796_v55, 0 }
 0x1c8   : >> { %1904 = vrot.lane.b32.xlu0 %v2977_v54, %s2715_s6  ;;  %1684 = vrot.lane.b32.xlu1 %v1328_v48, %s2714_s5 }
 0x1cc   : >> { %1908 = vrot.lane.b32.xlu0 %v1900_v56, %s2715_s6  ;;  %1688 = vrot.lane.b32.xlu1 %v1330_v50, %s2714_s5  ;;  %v1801_v50 = vsel %vm272_vm5, %v2977_v54, 0 }
 0x1d0   : >> { %2021 = vrot.lane.b32.xlu0 %v2984_v59, %s2716_s7  ;;  %1906 = vrot.lane.b32.xlu1 %v2984_v59, %s2715_s6 }
 0x1d4   : >> { %2134 = vrot.lane.b32.xlu0 %v2977_v54, %s2717_s8  ;;  %2019 = vrot.lane.b32.xlu1 %v2977_v54, %s2716_s7 }
 0x1d8   : >> { %2138 = vrot.lane.b32.xlu0 %v2130_v2, %s2717_s8  ;;  %2023 = vrot.lane.b32.xlu1 %v2015_v43, %s2716_s7 }
 0x1dc   : >> { %2251 = vrot.lane.b32.xlu0 %v2984_v59, %s2718_s9  ;;  %2136 = vrot.lane.b32.xlu1 %v2984_v59, %s2717_s8 }
 0x1e0   : >> { %2355 = vperm.xlu0 %2685, %v237_v44   ;;  %2249 = vrot.lane.b32.xlu1 %v2977_v54, %s2718_s9  ;;  %v229_v54 = vld [vmem:[%s2832_s18 + $0x1a] sm:$0x3] }
 0x1e4   : >> { %2253 = vrot.lane.b32.xlu1 %v2245_v52, %s2718_s9 }
 0x21e   : >> { %v1340_v45 = vpop.permute.xlu0 %1339  ;;  %v1336_v53 = vpop.permute.xlu1 %1335 }
 0x222   : >> { %v1440_v60 = vpop.permute.xlu0 %1439  ;;  %v1338_v61 = vpop.permute.xlu1 %1337 }
 0x223   : >> { %v1343_v3 = vsel %vm264_vm4, %v1336_v53, %v1338_v61  ;;  %v1344_v62 = vsel %vm264_vm4, %v1338_v61, %v1340_v45 }
 0x224   : >> { %v1350_v4 = vsel %vm272_vm5, %v1343_v3, 0  ;;  %2482 = vmatprep.subr.msk.bf16.mxu0 %vm272_vm5, %v1344_v62 }
 0x225   : >> { %1373 = vmatpush1.bf16.msra.mxu0 %v1350_v4 }
 0x226   : >> { %v1444_v6 = vpop.permute.xlu0 %1443  ;;  %v1342_v8 = vpop.permute.xlu1 %1341 }
 0x227   : >> { %v1345_v9 = vsel %vm264_vm4, %v1340_v45, %v1342_v8 }
 0x228   : >> { %v1356_v7 = vsel %vm272_vm5, %v1345_v9, 0  ;;  %2483 = vmatmul.mubr.msk.bf16.vlgmr.msra.gmra.mxu0 %vm268_vm6, %v226_v5  ;;  %v231_v9 = vld [vmem:[%s2832_s18 + $0x1e] sm:$0x3] }
 0x229   : >> { %2604 = vmatpush3.bf16.msra.mxu1 %v1356_v7  ;;  %1494 = vmatprep.mubr.bf16.mxu0 %v2710_v12 }
 0x22a   : >> { %v1560_v10 = vpop.permute.xlu0 %1559  ;;  %v1442_v14 = vpop.permute.xlu1 %1441  ;;  %2609 = vmatprep.subr.bf16.mxu1 %v2709_v11 }
 0x22b   : >> { %v1447_v15 = vsel %vm371_vm7, %v1440_v60, %v1442_v14  ;;  %v1448_v16 = vsel %vm371_vm7, %v1442_v14, %v1444_v6  ;;  %v230_v60 = vld [vmem:[%s2832_s18 + $0x1c] sm:$0x3] }
 0x22c   : >> { %v1454_v17 = vsel %vm272_vm5, %v1447_v15, 0  ;;  %2606 = vmatmul.mubr.msk.bf16.vlgmr.msra.gmra.mxu1 %vm268_vm6, %v226_v5  ;;  %2485 = vmatprep.subr.msk.bf16.mxu0 %vm272_vm5, %v1448_v16 }
 0x22d   : >> { %1477 = vmatpush1.bf16.msra.mxu0 %v1454_v17  ;;  %2611 = vmatprep.mubr.msk.bf16.mxu1 %vm2711_vm3, %v2709_v11 }
 0x22e   : >> { %v1564_v19 = vpop.permute.xlu0 %1563  ;;  %v1446_v20 = vpop.permute.xlu1 %1445 }
 0x22f   : >> { %v1449_v21 = vsel %vm371_vm7, %v1444_v6, %v1446_v20 }
 0x230   : >> { %v1460_v23 = vsel %vm272_vm5, %v1449_v21, 0  ;;  %2486 = vmatmul.mubr.msk.bf16.vlgmr.msra.gmra.mxu0 %vm268_vm6, %v225_v18  ;;  %v233_v21 = vld [vmem:[%s2832_s18 + $0x22] sm:$0x3] }
 0x231   : >> { %2610 = vmatpush3.bf16.msra.mxu1 %v1460_v23  ;;  %1614 = vmatprep.mubr.bf16.mxu0 %v2710_v12 }
 0x232   : >> { %v1683_v24 = vpop.permute.xlu0 %1682  ;;  %v1562_v25 = vpop.permute.xlu1 %1561  ;;  %2615 = vmatprep.subr.bf16.mxu1 %v2709_v11 }
 0x233   : >> { %v1567_v27 = vsel %vm492_vm8, %v1560_v10, %v1562_v25  ;;  %v1568_v28 = vsel %vm492_vm8, %v1562_v25, %v1564_v19 }
 0x234   : >> { %v1574_v29 = vsel %vm272_vm5, %v1567_v27, 0  ;;  %2612 = vmatmul.mubr.msk.bf16.vlgmr.msra.gmra.mxu1 %vm268_vm6, %v225_v18  ;;  %2488 = vmatprep.subr.msk.bf16.mxu0 %vm272_vm5, %v1568_v28  ;;  %v232_v18 = vld [vmem:[%s2832_s18 + $0x20] sm:$0x3] }
 0x235   : >> { %1597 = vmatpush1.bf16.msra.mxu0 %v1574_v29  ;;  %2617 = vmatprep.mubr.msk.bf16.mxu1 %vm2711_vm3, %v2709_v11 }
 0x236   : >> { %v1687_v31 = vpop.permute.xlu0 %1686  ;;  %v1566_v33 = vpop.permute.xlu1 %1565 }
 0x237   : >> { %v1569_v34 = vsel %vm492_vm8, %v1564_v19, %v1566_v33 }
 0x238   : >> { %v1580_v35 = vsel %vm272_vm5, %v1569_v34, 0  ;;  %2489 = vmatmul.mubr.msk.bf16.vlgmr.msra.gmra.mxu0 %vm268_vm6, %v227_v30 }
 0x239   : >> { %2616 = vmatpush3.bf16.msra.mxu1 %v1580_v35  ;;  %1737 = vmatprep.mubr.bf16.mxu0 %v2710_v12 }
 0x23a   : >> { %v1905_v36 = vpop.permute.xlu0 %1904  ;;  %v1685_v37 = vpop.permute.xlu1 %1684  ;;  %2621 = vmatprep.subr.bf16.mxu1 %v2709_v11 }
 0x23b   : >> { %v1690_v38 = vsel %vm616_vm9, %v1683_v24, %v1685_v37  ;;  %v1691_v39 = vsel %vm616_vm9, %v1685_v37, %v1687_v31 }
 0x23c   : >> { %v1697_v40 = vsel %vm272_vm5, %v1690_v38, 0  ;;  %2618 = vmatmul.mubr.msk.bf16.vlgmr.msra.gmra.mxu1 %vm268_vm6, %v227_v30  ;;  %2491 = vmatprep.subr.msk.bf16.mxu0 %vm272_vm5, %v1691_v39 }
 0x23d   : >> { %1720 = vmatpush1.bf16.msra.mxu0 %v1697_v40  ;;  %2623 = vmatprep.mubr.msk.bf16.mxu1 %vm2711_vm3, %v2709_v11 }
 0x23e   : >> { %v1909_v46 = vpop.permute.xlu0 %1908  ;;  %2494 = vmatprep.subr.msk.bf16.mxu0 %vm272_vm5, %v2984_v59  ;;  %v1689_v47 = vpop.permute.xlu1 %1688 }
 0x23f   : >> { %v1692_v48 = vsel %vm616_vm9, %v1687_v31, %v1689_v47  ;;  %v1922_v45 = vsel %vm272_vm5, %v1909_v46, 0 }
 0x240   : >> { %v1703_v49 = vsel %vm272_vm5, %v1692_v48, 0  ;;  %2492 = vmatmul.mubr.msk.bf16.vlgmr.msra.gmra.mxu0 %vm268_vm6, %v228_v41 }
 0x241   : >> { %2622 = vmatpush3.bf16.msra.mxu1 %v1703_v49  ;;  %1824 = vmatpush1.bf16.msra.mxu0 %v1801_v50 }
 0x242   : >> { %v2022_v56 = vpop.permute.xlu0 %2021  ;;  %v1907_v57 = vpop.permute.xlu1 %1906  ;;  %2627 = vmatprep.subr.bf16.mxu1 %v2709_v11  ;;  %1841 = vmatprep.mubr.bf16.mxu0 %v2710_v12 }
 0x243   : >> { %v1911_v59 = vsel %vm835_vm10, %v1907_v57, %v1909_v46  ;;  %v1910_v1 = vsel %vm835_vm10, %v1905_v36, %v1907_v57 }
 0x244   : >> { %2624 = vmatmul.mubr.msk.bf16.vlgmr.msra.gmra.mxu1 %vm268_vm6, %v228_v41  ;;  %2497 = vmatprep.subr.msk.bf16.mxu0 %vm272_vm5, %v1911_v59  ;;  %v1916_v43 = vsel %vm272_vm5, %v1910_v1, 0 }
 0x245   : >> { %2628 = vmatpush3.bf16.msra.mxu1 %v1807_v63  ;;  %2629 = vmatprep.mubr.msk.bf16.mxu1 %vm2711_vm3, %v2709_v11 }
 0x246   : >> { %v2020_v2 = vpop.permute.xlu1 %2019  ;;  %2633 = vmatprep.subr.bf16.mxu1 %v2709_v11  ;;  %v2135_v44 = vpop.permute.xlu0 %2134 }
 0x247   : >> { %v2025_v53 = vsel %vm951_vm11, %v2020_v2, %v2022_v56 }
 0x248   : >> { %2495 = vmatmul.mubr.msk.bf16.vlgmr.msra.gmra.mxu0 %vm268_vm6, %v229_v54  ;;  %v2031_v4 = vsel %vm272_vm5, %v2025_v53, 0 }
 0x249   : >> { %1939 = vmatpush1.bf16.msra.mxu0 %v1916_v43  ;;  %1956 = vmatprep.mubr.bf16.mxu0 %v2710_v12 }
 0x24a   : >> { %v2024_v51 = vpop.permute.xlu1 %2023  ;;  %v2139_v61 = vpop.permute.xlu0 %2138 }
 0x24b   : >> { %v2026_v52 = vsel %vm951_vm11, %v2022_v56, %v2024_v51  ;;  %v2037_v6 = vsel %vm272_vm5, %v2024_v51, 0  ;;  %v2152_v16 = vsel %vm272_vm5, %v2139_v61, 0 }
 0x24c   : >> { %2630 = vmatmul.mubr.msk.bf16.vlgmr.msra.gmra.mxu1 %vm268_vm6, %v229_v54  ;;  %2500 = vmatprep.subr.msk.bf16.mxu0 %vm272_vm5, %v2026_v52 }
 0x24d   : >> { %2634 = vmatpush3.bf16.msra.mxu1 %v1922_v45  ;;  %2635 = vmatprep.mubr.msk.bf16.mxu1 %vm2711_vm3, %v2709_v11 }
 0x24e   : >> { %v2137_v3 = vpop.permute.xlu1 %2136  ;;  %2639 = vmatprep.subr.bf16.mxu1 %v2709_v11  ;;  %v2252_v7 = vpop.permute.xlu0 %2251 }
 0x24f   : >> { %v2141_v62 = vsel %vm1067_vm12, %v2137_v3, %v2139_v61  ;;  %v2140_v8 = vsel %vm1067_vm12, %v2135_v44, %v2137_v3 }
 0x250   : >> { %2498 = vmatmul.mubr.msk.bf16.vlgmr.msra.gmra.mxu0 %vm268_vm6, %v230_v60  ;;  %v2146_v15 = vsel %vm272_vm5, %v2140_v8, 0 }
 0x251   : >> { %2054 = vmatpush1.bf16.msra.mxu0 %v2031_v4  ;;  %2071 = vmatprep.mubr.bf16.mxu0 %v2710_v12 }
 0x252   : >> { %2503 = vmatprep.subr.msk.bf16.mxu0 %vm272_vm5, %v2141_v62  ;;  %v2250_v5 = vpop.permute.xlu1 %2249 }
 0x253   : >> { %v2255_v17 = vsel %vm1183_vm13, %v2250_v5, %v2252_v7 }
 0x254   : >> { %2636 = vmatmul.mubr.msk.bf16.vlgmr.msra.gmra.mxu1 %vm268_vm6, %v230_v60  ;;  %v2261_v19 = vsel %vm272_vm5, %v2255_v17, 0 }
 0x255   : >> { %2640 = vmatpush3.bf16.msra.mxu1 %v2037_v6  ;;  %2641 = vmatprep.mubr.msk.bf16.mxu1 %vm2711_vm3, %v2709_v11 }
 0x256   : >> { %v2254_v10 = vpop.permute.xlu1 %2253  ;;  %2645 = vmatprep.subr.bf16.mxu1 %v2709_v11 }
 0x257   : >> { %v2256_v14 = vsel %vm1183_vm13, %v2252_v7, %v2254_v10  ;;  %v2267_v20 = vsel %vm272_vm5, %v2254_v10, 0 }
 0x258   : >> { %2501 = vmatmul.mubr.msk.bf16.vlgmr.msra.gmra.mxu0 %vm268_vm6, %v231_v9 }
 0x259   : >> { %2169 = vmatpush1.bf16.msra.mxu0 %v2146_v15  ;;  %2186 = vmatprep.mubr.bf16.mxu0 %v2710_v12 }
 0x25a   : >> { %2506 = vmatprep.subr.msk.bf16.mxu0 %vm272_vm5, %v2256_v14 }
 0x25c   : >> { %2642 = vmatmul.mubr.msk.bf16.vlgmr.msra.gmra.mxu1 %vm268_vm6, %v231_v9 }
 0x25d   : >> { %2646 = vmatpush3.bf16.msra.mxu1 %v2152_v16  ;;  %2647 = vmatprep.mubr.msk.bf16.mxu1 %vm2711_vm3, %v2709_v11 }
 0x25e   : >> { %2651 = vmatprep.subr.bf16.mxu1 %v2709_v11 }
 0x260   : >> { %2504 = vmatmul.mubr.msk.bf16.vlgmr.msra.gmra.mxu0 %vm268_vm6, %v232_v18 }
 0x261   : >> { %2284 = vmatpush1.bf16.msra.mxu0 %v2261_v19  ;;  %2301 = vmatprep.mubr.bf16.mxu0 %v2710_v12 }
 0x264   : >> { %2648 = vmatmul.mubr.msk.bf16.vlgmr.msra.gmra.mxu1 %vm268_vm6, %v232_v18 }
 0x265   : >> { %2652 = vmatpush3.bf16.msra.mxu1 %v2267_v20  ;;  %2653 = vmatprep.mubr.msk.bf16.mxu1 %vm2711_vm3, %v2709_v11 }
 0x268   : >> { %2507 = vmatmul.mubr.msk.bf16.vlgmr.msra.gmra.mxu0 %vm268_vm6, %v233_v21 }
 0x26c   : >> { %2654 = vmatmul.mubr.msk.bf16.vlgmr.msra.gmra.mxu1 %vm268_vm6, %v233_v21 }
 0x2e8   : >> { %v1392_v23 = vpop.f32.mrf.mxu0 }
 0x2ea   : >> { %v1394_v24 = vpop.f32.mrf.mxu0 }
 0x2ec   : >> { %v1396_v25 = vpop.f32.mrf.mxu0  ;;  %v1433_v27 = vpop.f32.mrf.mxu1 }
 0x2ee   : >> { %v1397_v28 = vpop.f32.mrf.mxu0  ;;  %v2607_v29 = vpop.f32.mrf.mxu1 }
 0x2f0   : >> { %v1436_v12 = vpop.f32.mrf.mxu1  ;;  %v1496_v30 = vpop.f32.mrf.mxu0 }
 0x2f1   : >> { %v1497_v14 = vadd.f32 %v1496_v30, %v1392_v23 }
 0x2f2   : >> { %v2608_v31 = vpop.f32.mrf.mxu1  ;;  %v1498_v33 = vpop.f32.mrf.mxu0 }
 0x2f3   : >> { %v1499_v17 = vadd.f32 %v1498_v33, %v1394_v24 }
 0x2f4   : >> { %v1500_v34 = vpop.f32.mrf.mxu0  ;;  %v1537_v35 = vpop.f32.mrf.mxu1 }
 0x2f5   : >> { %v1538_v21 = vadd.f32 %v1537_v35, %v1433_v27 }
 0x2f6   : >> { %v1501_v36 = vpop.f32.mrf.mxu0  ;;  %v2613_v37 = vpop.f32.mrf.mxu1 }
 0x2f8   : >> { %v1540_v38 = vpop.f32.mrf.mxu1  ;;  %v1616_v11 = vpop.f32.mrf.mxu0 }
 0x2f9   : >> { %v1663_v18 = vadd.f32 %v1616_v11, %v1497_v14 }
 0x2fa   : >> { %v2614_v39 = vpop.f32.mrf.mxu1  ;;  %v1618_v40 = vpop.f32.mrf.mxu0 }
 0x2fb   : >> { %v1664_v25 = vadd.f32 %v1618_v40, %v1499_v17 }
 0x2fc   : >> { %v1620_v41 = vpop.f32.mrf.mxu0  ;;  %v1657_v42 = vpop.f32.mrf.mxu1 }
 0x2fd   : >> { %v1665_v31 = vadd.f32 %v1657_v42, %v1538_v21  ;;  %v2356_v42 = vpop.permute.xlu0 %2355 }
 0x2fe   : >> { %v1621_v46 = vpop.f32.mrf.mxu0  ;;  %v2619_v47 = vpop.f32.mrf.mxu1 }
 0x300   : >> { %v1660_v48 = vpop.f32.mrf.mxu1  ;;  %v1739_v49 = vpop.f32.mrf.mxu0 }
 0x301   : >> { %v1786_v28 = vadd.f32 %v1739_v49, %v1663_v18 }
 0x302   : >> { %v2620_v50 = vpop.f32.mrf.mxu1  ;;  %v1741_v55 = vpop.f32.mrf.mxu0 }
 0x303   : >> { %v1787_v34 = vadd.f32 %v1741_v55, %v1664_v25 }
 0x304   : >> { %v1743_v56 = vpop.f32.mrf.mxu0  ;;  %v1780_v57 = vpop.f32.mrf.mxu1 }
 0x305   : >> { %v1788_v39 = vadd.f32 %v1780_v57, %v1665_v31 }
 0x306   : >> { %v1744_v59 = vpop.f32.mrf.mxu0  ;;  %v2625_v63 = vpop.f32.mrf.mxu1 }
 0x308   : >> { %v1783_v1 = vpop.f32.mrf.mxu1  ;;  %v1843_v54 = vpop.f32.mrf.mxu0 }
 0x309   : >> { %v1890_v36 = vadd.f32 %v1843_v54, %v1786_v28 }
 0x30a   : >> { %v2626_v2 = vpop.f32.mrf.mxu1  ;;  %v1845_v43 = vpop.f32.mrf.mxu0 }
 0x30b   : >> { %v1891_v41 = vadd.f32 %v1845_v43, %v1787_v34 }
 0x30c   : >> { %v1847_v44 = vpop.f32.mrf.mxu0  ;;  %v1884_v51 = vpop.f32.mrf.mxu1 }
 0x30d   : >> { %v1892_v47 = vadd.f32 %v1884_v51, %v1788_v39 }
 0x30e   : >> { %v1848_v52 = vpop.f32.mrf.mxu0  ;;  %v2631_v45 = vpop.f32.mrf.mxu1 }
 0x310   : >> { %v1887_v53 = vpop.f32.mrf.mxu1  ;;  %v1958_v60 = vpop.f32.mrf.mxu0 }
 0x311   : >> { %v2005_v46 = vadd.f32 %v1958_v60, %v1890_v36 }
 0x312   : >> { %v2632_v61 = vpop.f32.mrf.mxu1  ;;  %v1960_v3 = vpop.f32.mrf.mxu0 }
 0x313   : >> { %v2006_v24 = vadd.f32 %v1960_v3, %v1891_v41 }
 0x314   : >> { %v1962_v62 = vpop.f32.mrf.mxu0  ;;  %v1999_v4 = vpop.f32.mrf.mxu1 }
 0x315   : >> { %v2007_v27 = vadd.f32 %v1999_v4, %v1892_v47  ;;  %v2370_v4 = vcombine.low %v2954_v26, %v2957_v32 }
 0x316   : >> { %v1963_v5 = vpop.f32.mrf.mxu0  ;;  %v2637_v6 = vpop.f32.mrf.mxu1 }
 0x318   : >> { %v2002_v8 = vpop.f32.mrf.mxu1  ;;  %v2073_v9 = vpop.f32.mrf.mxu0 }
 0x319   : >> { %v2120_v33 = vadd.f32 %v2073_v9, %v2005_v46 }
 0x31a   : >> { %v2638_v7 = vpop.f32.mrf.mxu1  ;;  %v2075_v10 = vpop.f32.mrf.mxu0 }
 0x31b   : >> { %v2121_v35 = vadd.f32 %v2075_v10, %v2006_v24 }
 0x31c   : >> { %v2077_v15 = vpop.f32.mrf.mxu0  ;;  %v2114_v16 = vpop.f32.mrf.mxu1 }
 0x31d   : >> { %v2122_v55 = vadd.f32 %v2114_v16, %v2007_v27 }
 0x31e   : >> { %v2078_v19 = vpop.f32.mrf.mxu0  ;;  %v2643_v20 = vpop.f32.mrf.mxu1 }
 0x320   : >> { %v2117_v29 = vpop.f32.mrf.mxu1  ;;  %v2188_v12 = vpop.f32.mrf.mxu0 }
 0x321   : >> { %v2235_v40 = vadd.f32 %v2188_v12, %v2120_v33 }
 0x322   : >> { %v2644_v37 = vpop.f32.mrf.mxu1  ;;  %v2190_v38 = vpop.f32.mrf.mxu0 }
 0x323   : >> { %v2236_v56 = vadd.f32 %v2190_v38, %v2121_v35 }
 0x324   : >> { %v2192_v23 = vpop.f32.mrf.mxu0  ;;  %v2229_v30 = vpop.f32.mrf.mxu1 }
 0x325   : >> { %v2237_v1 = vadd.f32 %v2229_v30, %v2122_v55 }
 0x326   : >> { %v2193_v11 = vpop.f32.mrf.mxu0  ;;  %v2649_v48 = vpop.f32.mrf.mxu1 }
 0x328   : >> { %v2232_v49 = vpop.f32.mrf.mxu1  ;;  %v2303_v50 = vpop.f32.mrf.mxu0 }
 0x329   : >> { %v2350_v59 = vadd.f32 %v2303_v50, %v2235_v40 }
 0x32a   : >> { %v2650_v63 = vpop.f32.mrf.mxu1  ;;  %v2305_v57 = vpop.f32.mrf.mxu0 }
 0x32b   : >> { %v2358_v54 = vadd.f32 %v2356_v42, %v2350_v59  ;;  %v2351_v2 = vadd.f32 %v2305_v57, %v2236_v56 }
 0x32c   : >> { %v2307_v43 = vpop.f32.mrf.mxu0  ;;  %v2344_v44 = vpop.f32.mrf.mxu1 }
 0x32d   : >> { %v2359_v51 = vadd.f32 %v2356_v42, %v2351_v2  ;;  %v2352_v52 = vadd.f32 %v2344_v44, %v2237_v1  ;;  %v2361_v60 = vmax.f32 %v2358_v54, 0.0 }
 0x32e   : >> { %v2308_v45 = vpop.f32.mrf.mxu0  ;;  %v2655_v53 = vpop.f32.mrf.mxu1 }
 0x32f   : >> { %v2362_v61 = vmax.f32 %v2359_v51, 0.0  ;;  %v2360_v3 = vadd.f32 %v2356_v42, %v2352_v52 }
 0x330   : >> { %v2347_v62 = vpop.f32.mrf.mxu1 }
 0x331   : >> { %v2366_v5 = vcombine.low %v2361_v60, %v2362_v61  ;;  %v2363_v6 = vmax.f32 %v2360_v3, 0.0 }
 0x332   : >> { %v2656_v8 = vpop.f32.mrf.mxu1 }
 0x333   : >> { %v2368_v9 = vadd.f32 %v2366_v5, %v2787_v13  ;;  %v2369_v7 = vadd.f32 %v2363_v6, %v2868_v58  ;;  %211 = sbr.rel (!%p209_p4) target bundleno = 16 (0x10), region = 75 }
 0x335   : >> { %v2372_v10 = vmul.f32 %v2370_v4, %v2368_v9  ;;  %v2373_v14 = vmul.f32 %v2369_v7, %v2951_v22 }
 0x337   : >> { %2374 = vst [vmem:[#allocation2 + $0x4] sm:$0xff] %v2372_v10  ;;  %2375 = vst.msk [vmem:[#allocation2 + $0xc] sm:$0xf] %vm1317_vm14, %v2373_v14 }
 0x33e   : > { %v2376_v26 = vld [vmem:[#allocation2 + $0x4] sm:$0xff]  ;;  %v2377_v32 = vld [vmem:[#allocation2 + $0xc] sm:$0xf] }
 0x33f   : > { %2378 = vst [vmem:[%s2763_s26] sm:$0xff] %v2376_v26  ;;  %2380 = vst.msk [vmem:[%s2763_s26 + $0x8] sm:$0xf] %vm1317_vm14, %v2377_v32 }
 0x340 PF: > { %s14_s15 = sadd.s32 1, %s2702_s15  }
 0x341   : > { %p11_p5 = scmp.ge.s32.totalorder %s14_s15, 4  }
 0x343   :  { %13 = sbr.rel (!%p11_p5) target bundleno = 1 (0x1), region = 86 }

// kernel: nbc_forward_nchw.1
= control target key start
LH: loop header
LB: loop body
LE: loop exit
PB: predicated region body
PF: predicated region fallthrough
CT: control target
= control target key end

     0   :  { %s2744_s15 = smov 0   ;;  %s3127_s0 = inlined_call_operand.vmem [shape: f32[2,4,451], index: 0, kind: input, shape index: {}]   ;;  %s3128_s1 = inlined_call_operand.vmem [shape: bf16[2,18,4,4], index: 1, kind: input, shape index: {}]   ;;  %s3129_s2 = inlined_call_operand.vmem [shape: f32[2,2,4,1], index: 2, kind: input, shape index: {}]   ;;  %s3130_s3 = inlined_call_operand.vmem [shape: f32[1,288], index: 3, kind: input, shape index: {}]   ;;  %s3131_s4 = inlined_call_operand.vmem [shape: f32[2,4,288], index: 4, kind: output, shape index: {}]  }
   0x1 LB: > { %s2445_s16 = sadd.s32 4294967295, %s2702_s15   ;;  %p2449_p0 = scmp.ge.s32.totalorder %s2702_s15, 1  ;;  %s2702_s15 = sphi %s2744_s15, %s14_s15  }
   0x2   : > { %p162_p1 = scmp.lt.s32.totalorder %s2702_s15, 3 }
   0x4   : > { %p163_p2 = pnand %p2449_p0, %p162_p1 }
   0x5   : > { %p188_p3 = scmp.lt.s32.totalorder (!%p163_p2), %s2445_s16, 1  ;;  %s2765_s27 = smov (!%p163_p2), 0  }
   0x6   : > { %166 = sbr.rel (%p163_p2) target bundleno = 832 (0x340), region = 36 }
   0xb   : > { %v2755_v0 = vld [vmem:[%s3130_s3] sm:$0x7]  ;;  %vm203_vm0 = vcmask 1043456   ;;  %vm204_vm1 = vcmask 547844   ;;  %s3133_s16 = smov (!%p188_p3, %s2445_s16), 1 }
   0xc   : > { %s2511_s19 = sshll.u32 %s3133_s16, 4  ;;  %s2657_s20 = smul.u32 12, %s3133_s16  ;;  %vm205_vm2 = vmor %vm204_vm1, %vm203_vm0 }
   0xd   : > { %s192_s23 = scalar_lea.vmem %s3127_s0, %s2511_s19 }
   0xe   : > { %s2763_s26 = scalar_lea.vmem %s3131_s4, %s2657_s20  ;;  %v200_v1 = vld [vmem:[%s192_s23] sm:$0xff]  ;;  %v201_v2 = vld [vmem:[%s192_s23 + $0x8] sm:$0xff] }
   0xf   : > { %202 = vst [vmem:[#allocation2] sm:$0xff] %v200_v1  ;;  %206 = vst.msk [vmem:[#allocation2 + $0x8] sm:$0xff] %vm205_vm2, %v201_v2 }
  0x10 LB: >> { %s2708_s28 = smov 18   ;;  %v2709_v11 = vmov 0.0   ;;  %v2710_v12 = vmov 0   ;;  %vm2711_vm3 = vmmov 0   ;;  %s2712_s29 = smov 19   ;;  %vm264_vm4 = vcmask 146432   ;;  %s2706_s27 = sphi %s2765_s27, %s212_s27  }
  0x11   : >> { %2549 = vmatprep.subr.bf16.mxu1 %v2709_v11  ;;  %314 = vmatprep.mubr.bf16.mxu0 %v2710_v12  ;;  %s2713_s30 = smov 17   ;;  %s2714_s5 = smov 1   ;;  %vm272_vm5 = vcmask 1041408   ;;  %vm268_vm6 = vcmask 31744   ;;  %vm371_vm7 = vcmask 154624   ;;  %vm492_vm8 = vcmask 138240  }
  0x12   : >> { %2551 = vmatprep.mubr.msk.bf16.mxu1 %vm2711_vm3, %v2709_v11  ;;  %2685 = vset.pattern.permute.xlu0 %v2710_v12  ;;  %s2715_s6 = smov 127   ;;  %s2716_s7 = smov 111   ;;  %vm616_vm9 = vcmask 7168   ;;  %vm835_vm10 = vcmask 1039360   ;;  %vm951_vm11 = vcmask 908288   ;;  %vm1067_vm12 = vcmask 900096  }
  0x13   : >> { %s2717_s8 = smov 110   ;;  %s2718_s9 = smov 109   ;;  %vm1183_vm13 = vcmask 891904   ;;  %vm1317_vm14 = vcmask 257024  }
  0x14   : >> { %s2454_s10 = sshll.u32 %s2706_s27, 3  ;;  %s2512_s14 = smul.u32 36, %s2706_s27 }
  0x15   : >> { %s2825_s13 = scalar_lea.vmem %s3129_s2, %s2454_s10  ;;  %s212_s27 = sadd.s32 1, %s2706_s27  }
  0x16   : >> { %v241_v3 = vld [vmem:[#allocation2 + $0x8] sm:$0xff]  ;;  %v240_v4 = vld [vmem:[#allocation2] sm:$0xff]  ;;  %s2832_s18 = scalar_lea.vmem %s3128_s1, %s2512_s14  ;;  %p209_p4 = scmp.ge.s32.totalorder %s212_s27, 2  }
  0x17   : >> { %v250_v5 = vpack.c.bf16 %v241_v3, %v241_v3  ;;  %v248_v6 = vpack.c.bf16 %v240_v4, %v240_v4  ;;  %v245_v7 = vcombine.high %v241_v3, %v241_v3  ;;  %v244_v8 = vcombine.high %v240_v4, %v240_v4  ;;  %v2787_v13 = vld [vmem:[#allocation2 + $0x4] sm:$0xff]  ;;  %v819_v17 = vld [vmem:[#allocation2 + $0xc] sm:$0xf]  ;;  %v236_v25 = vld [vmem:[%s2825_s13] sm:$0xf] }
  0x18   : >> { %v821_v14 = vcombine.high %v2787_v13, %v2787_v13  ;;  %v2797_v15 = vpack.c.bf16 %v2787_v13, %v2787_v13  ;;  %v825_v18 = vpack.c.bf16 %v819_v17, %v819_v17  ;;  %v935_v19 = vld [vmem:[#allocation2 + $0xc] sm:$0xf]  ;;  %v217_v35 = vld [vmem:[%s2832_s18 + $0x2] sm:$0x3]  ;;  %v216_v45 = vld [vmem:[%s2832_s18] sm:$0x3] }
  0x19   : >> { %260 = vrot.lane.b32.xlu1 %v250_v5, %s2708_s28  ;;  %256 = vrot.lane.b32.xlu0 %v248_v6, %s2708_s28  ;;  %v251_v9 = vpack.c.bf16 %v245_v7, %v245_v7  ;;  %v249_v10 = vpack.c.bf16 %v244_v8, %v244_v8  ;;  %v941_v20 = vpack.c.bf16 %v935_v19, %v935_v19  ;;  %v1051_v21 = vld [vmem:[#allocation2 + $0xc] sm:$0xf]  ;;  %v218_v55 = vld [vmem:[%s2832_s18 + $0x4] sm:$0x3]  ;;  %v219_v4 = vld [vmem:[%s2832_s18 + $0x6] sm:$0x3] }
  0x1a   : >> { %v2799_v16 = vpack.c.bf16 %v821_v14, %v821_v14  ;;  %v1057_v22 = vpack.c.bf16 %v1051_v21, %v1051_v21  ;;  %v1167_v23 = vld [vmem:[#allocation2 + $0xc] sm:$0xf] }
  0x1b   : >> { %v1173_v24 = vpack.c.bf16 %v1167_v23, %v1167_v23  ;;  %v2868_v58 = vld [vmem:[#allocation2 + $0xc] sm:$0xf] }
  0x1c   : >> { %v721_v62 = vpack.c.bf16 %v2868_v58, %v2868_v58 }
  0x1d   : >> { %262 = vrot.lane.b32.xlu1 %v251_v9, %s2708_s28  ;;  %258 = vrot.lane.b32.xlu0 %v249_v10, %s2708_s28 }
  0x1e   : >> { %v732_v7 = vsel %vm272_vm5, %v721_v62, 0 }
  0x21   : >> { %365 = vrot.lane.b32.xlu1 %v249_v10, %s2712_s29  ;;  %363 = vrot.lane.b32.xlu0 %v248_v6, %s2712_s29 }
  0x25   : >> { %369 = vrot.lane.b32.xlu1 %v251_v9, %s2712_s29  ;;  %367 = vrot.lane.b32.xlu0 %v250_v5, %s2712_s29 }
  0x29   : >> { %486 = vrot.lane.b32.xlu1 %v249_v10, %s2713_s30  ;;  %484 = vrot.lane.b32.xlu0 %v248_v6, %s2713_s30 }
  0x2d   : >> { %490 = vrot.lane.b32.xlu1 %v251_v9, %s2713_s30  ;;  %488 = vrot.lane.b32.xlu0 %v250_v5, %s2713_s30 }
  0x31   : >> { %610 = vrot.lane.b32.xlu1 %v249_v10, %s2714_s5  ;;  %608 = vrot.lane.b32.xlu0 %v248_v6, %s2714_s5  ;;  %v726_v6 = vsel %vm272_vm5, %v2797_v15, 0 }
  0x35   : >> { %614 = vrot.lane.b32.xlu1 %v251_v9, %s2714_s5  ;;  %612 = vrot.lane.b32.xlu0 %v250_v5, %s2714_s5 }
  0x39   : >> { %829 = vrot.lane.b32.xlu0 %v2797_v15, %s2715_s6  ;;  %831 = vrot.lane.b32.xlu1 %v2799_v16, %s2715_s6 }
  0x3d   : >> { %833 = vrot.lane.b32.xlu0 %v825_v18, %s2715_s6  ;;  %945 = vrot.lane.b32.xlu1 %v2797_v15, %s2716_s7 }
  0x41   : >> { %949 = vrot.lane.b32.xlu1 %v941_v20, %s2716_s7  ;;  %947 = vrot.lane.b32.xlu0 %v2799_v16, %s2716_s7 }
  0x45   : >> { %1061 = vrot.lane.b32.xlu0 %v2797_v15, %s2717_s8  ;;  %1063 = vrot.lane.b32.xlu1 %v2799_v16, %s2717_s8 }
  0x49   : >> { %1065 = vrot.lane.b32.xlu0 %v1057_v22, %s2717_s8  ;;  %1177 = vrot.lane.b32.xlu1 %v2797_v15, %s2718_s9 }
  0x4d   : >> { %1181 = vrot.lane.b32.xlu1 %v1173_v24, %s2718_s9  ;;  %1179 = vrot.lane.b32.xlu0 %v2799_v16, %s2718_s9 }
  0x51   : >> { %1284 = vperm.xlu0 %2685, %v236_v25   ;;  %v221_v25 = vld [vmem:[%s2832_s18 + $0xa] sm:$0x3] }
  0x8b   : >> { %v261_v26 = vpop.permute.xlu1 %260  ;;  %v257_v27 = vpop.permute.xlu0 %256 }
  0x8f   : >> { %v263_v28 = vpop.permute.xlu1 %262  ;;  %v259_v29 = vpop.permute.xlu0 %258 }
  0x90   : >> { %v266_v30 = vsel %vm264_vm4, %v259_v29, %v261_v26  ;;  %v265_v31 = vsel %vm264_vm4, %v257_v27, %v259_v29  ;;  %v267_v32 = vsel %vm264_vm4, %v261_v26, %v263_v28 }
  0x91   : >> { %2455 = vmatprep.subr.msk.bf16.mxu0 %vm272_vm5, %v266_v30  ;;  %v274_v33 = vsel %vm272_vm5, %v265_v31, 0  ;;  %v280_v34 = vsel %vm272_vm5, %v267_v32, 0  ;;  %v222_v32 = vld [vmem:[%s2832_s18 + $0xc] sm:$0x3] }
  0x92   : >> { %297 = vmatpush1.bf16.msra.mxu0 %v274_v33  ;;  %2550 = vmatpush3.bf16.msra.mxu1 %v280_v34 }
  0x93   : >> { %v366_v36 = vpop.permute.xlu1 %365  ;;  %v364_v37 = vpop.permute.xlu0 %363  ;;  %2555 = vmatprep.subr.bf16.mxu1 %v2709_v11 }
  0x94   : >> { %v372_v38 = vsel %vm371_vm7, %v364_v37, %v366_v36 }
  0x95   : >> { %2456 = vmatmul.mubr.msk.bf16.vlgmr.msra.gmra.mxu0 %vm268_vm6, %v217_v35  ;;  %2552 = vmatmul.mubr.msk.bf16.vlgmr.msra.gmra.mxu1 %vm268_vm6, %v217_v35  ;;  %v379_v43 = vsel %vm272_vm5, %v372_v38, 0 }
  0x96   : >> { %419 = vmatprep.mubr.bf16.mxu0 %v2710_v12  ;;  %2557 = vmatprep.mubr.msk.bf16.mxu1 %vm2711_vm3, %v2709_v11 }
  0x97   : >> { %v370_v39 = vpop.permute.xlu1 %369  ;;  %v368_v40 = vpop.permute.xlu0 %367 }
  0x98   : >> { %v373_v41 = vsel %vm371_vm7, %v366_v36, %v368_v40  ;;  %v374_v42 = vsel %vm371_vm7, %v368_v40, %v370_v39  ;;  %v223_v39 = vld [vmem:[%s2832_s18 + $0xe] sm:$0x3] }
  0x99   : >> { %v385_v44 = vsel %vm272_vm5, %v374_v42, 0  ;;  %2458 = vmatprep.subr.msk.bf16.mxu0 %vm272_vm5, %v373_v41  ;;  %v224_v42 = vld [vmem:[%s2832_s18 + $0x10] sm:$0x3] }
  0x9a   : >> { %402 = vmatpush1.bf16.msra.mxu0 %v379_v43  ;;  %2556 = vmatpush3.bf16.msra.mxu1 %v385_v44 }
  0x9b   : >> { %v487_v46 = vpop.permute.xlu1 %486  ;;  %v485_v47 = vpop.permute.xlu0 %484  ;;  %2561 = vmatprep.subr.bf16.mxu1 %v2709_v11 }
  0x9c   : >> { %v493_v48 = vsel %vm492_vm8, %v485_v47, %v487_v46 }
  0x9d   : >> { %2459 = vmatmul.mubr.msk.bf16.vlgmr.msra.gmra.mxu0 %vm268_vm6, %v216_v45  ;;  %2558 = vmatmul.mubr.msk.bf16.vlgmr.msra.gmra.mxu1 %vm268_vm6, %v216_v45  ;;  %v500_v53 = vsel %vm272_vm5, %v493_v48, 0 }
  0x9e   : >> { %540 = vmatprep.mubr.bf16.mxu0 %v2710_v12  ;;  %2563 = vmatprep.mubr.msk.bf16.mxu1 %vm2711_vm3, %v2709_v11 }
  0x9f   : >> { %v491_v49 = vpop.permute.xlu1 %490  ;;  %v489_v50 = vpop.permute.xlu0 %488 }
  0xa0   : >> { %v494_v51 = vsel %vm492_vm8, %v487_v46, %v489_v50  ;;  %v495_v52 = vsel %vm492_vm8, %v489_v50, %v491_v49 }
  0xa1   : >> { %v506_v54 = vsel %vm272_vm5, %v495_v52, 0  ;;  %2461 = vmatprep.subr.msk.bf16.mxu0 %vm272_vm5, %v494_v51 }
  0xa2   : >> { %523 = vmatpush1.bf16.msra.mxu0 %v500_v53  ;;  %2562 = vmatpush3.bf16.msra.mxu1 %v506_v54 }
  0xa3   : >> { %v611_v56 = vpop.permute.xlu1 %610  ;;  %v609_v57 = vpop.permute.xlu0 %608  ;;  %2567 = vmatprep.subr.bf16.mxu1 %v2709_v11 }
  0xa4   : >> { %v617_v59 = vsel %vm616_vm9, %v609_v57, %v611_v56 }
  0xa5   : >> { %2462 = vmatmul.mubr.msk.bf16.vlgmr.msra.gmra.mxu0 %vm268_vm6, %v218_v55  ;;  %2564 = vmatmul.mubr.msk.bf16.vlgmr.msra.gmra.mxu1 %vm268_vm6, %v218_v55  ;;  %v624_v2 = vsel %vm272_vm5, %v617_v59, 0 }
  0xa6   : >> { %664 = vmatprep.mubr.bf16.mxu0 %v2710_v12  ;;  %2569 = vmatprep.mubr.msk.bf16.mxu1 %vm2711_vm3, %v2709_v11 }
  0xa7   : >> { %v615_v60 = vpop.permute.xlu1 %614  ;;  %v613_v61 = vpop.permute.xlu0 %612 }
  0xa8   : >> { %v618_v63 = vsel %vm616_vm9, %v611_v56, %v613_v61  ;;  %v619_v1 = vsel %vm616_vm9, %v613_v61, %v615_v60 }
  0xa9   : >> { %v630_v3 = vsel %vm272_vm5, %v619_v1, 0  ;;  %2464 = vmatprep.subr.msk.bf16.mxu0 %vm272_vm5, %v618_v63 }
  0xaa   : >> { %647 = vmatpush1.bf16.msra.mxu0 %v624_v2  ;;  %2568 = vmatpush3.bf16.msra.mxu1 %v630_v3 }
  0xab   : >> { %v830_v5 = vpop.permute.xlu0 %829  ;;  %2467 = vmatprep.subr.msk.bf16.mxu0 %vm272_vm5, %v2799_v16  ;;  %2573 = vmatprep.subr.bf16.mxu1 %v2709_v11  ;;  %v832_v8 = vpop.permute.xlu1 %831  ;;  %v220_v16 = vld [vmem:[%s2832_s18 + $0x8] sm:$0x3] }
  0xac   : >> { %v836_v14 = vsel %vm835_vm10, %v830_v5, %v832_v8 }
  0xad   : >> { %2465 = vmatmul.mubr.msk.bf16.vlgmr.msra.gmra.mxu0 %vm268_vm6, %v219_v4  ;;  %2570 = vmatmul.mubr.msk.bf16.vlgmr.msra.gmra.mxu1 %vm268_vm6, %v219_v4  ;;  %v842_v17 = vsel %vm272_vm5, %v836_v14, 0 }
  0xae   : >> { %749 = vmatpush1.bf16.msra.mxu0 %v726_v6  ;;  %2574 = vmatpush3.bf16.msra.mxu1 %v732_v7 }
  0xaf   : >> { %v834_v9 = vpop.permute.xlu0 %833  ;;  %766 = vmatprep.mubr.bf16.mxu0 %v2710_v12  ;;  %2575 = vmatprep.mubr.msk.bf16.mxu1 %vm2711_vm3, %v2709_v11  ;;  %v946_v10 = vpop.permute.xlu1 %945 }
  0xb0   : >> { %v837_v15 = vsel %vm835_vm10, %v832_v8, %v834_v9  ;;  %2579 = vmatprep.subr.bf16.mxu1 %v2709_v11  ;;  %v848_v18 = vsel %vm272_vm5, %v834_v9, 0 }
  0xb1   : >> { %2470 = vmatprep.subr.msk.bf16.mxu0 %vm272_vm5, %v837_v15 }
  0xb3   : >> { %v950_v19 = vpop.permute.xlu1 %949  ;;  %v948_v20 = vpop.permute.xlu0 %947 }
  0xb4   : >> { %v953_v21 = vsel %vm951_vm11, %v948_v20, %v950_v19  ;;  %v952_v24 = vsel %vm951_vm11, %v946_v10, %v948_v20  ;;  %v964_v26 = vsel %vm272_vm5, %v950_v19, 0 }
  0xb5   : >> { %2468 = vmatmul.mubr.msk.bf16.vlgmr.msra.gmra.mxu0 %vm268_vm6, %v220_v16  ;;  %2576 = vmatmul.mubr.msk.bf16.vlgmr.msra.gmra.mxu1 %vm268_vm6, %v220_v16  ;;  %v958_v27 = vsel %vm272_vm5, %v952_v24, 0 }
  0xb6   : >> { %865 = vmatpush1.bf16.msra.mxu0 %v842_v17  ;;  %2580 = vmatpush3.bf16.msra.mxu1 %v848_v18 }
  0xb7   : >> { %882 = vmatprep.mubr.bf16.mxu0 %v2710_v12  ;;  %2581 = vmatprep.mubr.msk.bf16.mxu1 %vm2711_vm3, %v2709_v11  ;;  %v1062_v22 = vpop.permute.xlu0 %1061  ;;  %v1064_v23 = vpop.permute.xlu1 %1063 }
  0xb8   : >> { %2473 = vmatprep.subr.msk.bf16.mxu0 %vm272_vm5, %v953_v21  ;;  %2585 = vmatprep.subr.bf16.mxu1 %v2709_v11  ;;  %v1068_v31 = vsel %vm1067_vm12, %v1062_v22, %v1064_v23 }
  0xb9   : >> { %v1074_v35 = vsel %vm272_vm5, %v1068_v31, 0 }
  0xbb   : >> { %v1066_v28 = vpop.permute.xlu0 %1065  ;;  %v1178_v29 = vpop.permute.xlu1 %1177 }
  0xbc   : >> { %v1069_v30 = vsel %vm1067_vm12, %v1064_v23, %v1066_v28  ;;  %v1080_v36 = vsel %vm272_vm5, %v1066_v28, 0 }
  0xbd   : >> { %2471 = vmatmul.mubr.msk.bf16.vlgmr.msra.gmra.mxu0 %vm268_vm6, %v221_v25  ;;  %2582 = vmatmul.mubr.msk.bf16.vlgmr.msra.gmra.mxu1 %vm268_vm6, %v221_v25 }
  0xbe   : >> { %981 = vmatpush1.bf16.msra.mxu0 %v958_v27  ;;  %2586 = vmatpush3.bf16.msra.mxu1 %v964_v26 }
  0xbf   : >> { %998 = vmatprep.mubr.bf16.mxu0 %v2710_v12  ;;  %2587 = vmatprep.mubr.msk.bf16.mxu1 %vm2711_vm3, %v2709_v11  ;;  %v1182_v33 = vpop.permute.xlu1 %1181  ;;  %v1180_v34 = vpop.permute.xlu0 %1179 }
  0xc0   : >> { %2476 = vmatprep.subr.msk.bf16.mxu0 %vm272_vm5, %v1069_v30  ;;  %2591 = vmatprep.subr.bf16.mxu1 %v2709_v11  ;;  %v1185_v37 = vsel %vm1183_vm13, %v1180_v34, %v1182_v33  ;;  %v1184_v38 = vsel %vm1183_vm13, %v1178_v29, %v1180_v34  ;;  %v1196_v40 = vsel %vm272_vm5, %v1182_v33, 0 }
  0xc1   : >> { %v1190_v41 = vsel %vm272_vm5, %v1184_v38, 0 }
  0xc5   : >> { %2474 = vmatmul.mubr.msk.bf16.vlgmr.msra.gmra.mxu0 %vm268_vm6, %v222_v32  ;;  %2588 = vmatmul.mubr.msk.bf16.vlgmr.msra.gmra.mxu1 %vm268_vm6, %v222_v32 }
  0xc6   : >> { %1097 = vmatpush1.bf16.msra.mxu0 %v1074_v35  ;;  %2592 = vmatpush3.bf16.msra.mxu1 %v1080_v36 }
  0xc7   : >> { %1114 = vmatprep.mubr.bf16.mxu0 %v2710_v12  ;;  %2593 = vmatprep.mubr.msk.bf16.mxu1 %vm2711_vm3, %v2709_v11 }
  0xc8   : >> { %2479 = vmatprep.subr.msk.bf16.mxu0 %vm272_vm5, %v1185_v37  ;;  %2597 = vmatprep.subr.bf16.mxu1 %v2709_v11 }
  0xcd   : >> { %2477 = vmatmul.mubr.msk.bf16.vlgmr.msra.gmra.mxu0 %vm268_vm6, %v223_v39  ;;  %2594 = vmatmul.mubr.msk.bf16.vlgmr.msra.gmra.mxu1 %vm268_vm6, %v223_v39 }
  0xce   : >> { %1213 = vmatpush1.bf16.msra.mxu0 %v1190_v41  ;;  %2598 = vmatpush3.bf16.msra.mxu1 %v1196_v40 }
  0xcf   : >> { %1230 = vmatprep.mubr.bf16.mxu0 %v2710_v12  ;;  %2599 = vmatprep.mubr.msk.bf16.mxu1 %vm2711_vm3, %v2709_v11 }
  0xd0   : >> { %2603 = vmatprep.subr.bf16.mxu1 %v2709_v11 }
  0xd5   : >> { %2480 = vmatmul.mubr.msk.bf16.vlgmr.msra.gmra.mxu0 %vm268_vm6, %v224_v42  ;;  %2600 = vmatmul.mubr.msk.bf16.vlgmr.msra.gmra.mxu1 %vm268_vm6, %v224_v42 }
  0xd6   : >> { %1390 = vmatprep.mubr.bf16.mxu0 %v2710_v12  ;;  %2605 = vmatprep.mubr.msk.bf16.mxu1 %vm2711_vm3, %v2709_v11 }
 0x155   : >> { %v316_v43 = vpop.f32.mrf.mxu0  ;;  %v357_v44 = vpop.f32.mrf.mxu1 }
 0x157   : >> { %v318_v45 = vpop.f32.mrf.mxu0  ;;  %v2553_v46 = vpop.f32.mrf.mxu1 }
 0x159   : >> { %v320_v47 = vpop.f32.mrf.mxu0  ;;  %v360_v48 = vpop.f32.mrf.mxu1 }
 0x15b   : >> { %v321_v49 = vpop.f32.mrf.mxu0  ;;  %v2554_v50 = vpop.f32.mrf.mxu1 }
 0x15d   : >> { %v421_v51 = vpop.f32.mrf.mxu0  ;;  %v462_v52 = vpop.f32.mrf.mxu1 }
 0x15e   : >> { %v422_v36 = vadd.f32 %v421_v51, %v316_v43  ;;  %v463_v37 = vadd.f32 %v462_v52, %v357_v44 }
 0x15f   : >> { %v423_v53 = vpop.f32.mrf.mxu0  ;;  %v2559_v54 = vpop.f32.mrf.mxu1 }
 0x160   : >> { %v424_v40 = vadd.f32 %v423_v53, %v318_v45  ;;  %v1294_v54 = vlaneseq }
 0x161   : >> { %v425_v55 = vpop.f32.mrf.mxu0  ;;  %v465_v56 = vpop.f32.mrf.mxu1 }
 0x162   : >> { %v1295_v52 = vshrl.u32 %v1294_v54, 7 }
 0x163   : >> { %v426_v57 = vpop.f32.mrf.mxu0  ;;  %v2560_v59 = vpop.f32.mrf.mxu1 }
 0x165   : >> { %v542_v60 = vpop.f32.mrf.mxu0  ;;  %v583_v61 = vpop.f32.mrf.mxu1 }
 0x166   : >> { %v589_v41 = vadd.f32 %v542_v60, %v422_v36  ;;  %v591_v42 = vadd.f32 %v583_v61, %v463_v37 }
 0x167   : >> { %v544_v62 = vpop.f32.mrf.mxu0  ;;  %v2565_v63 = vpop.f32.mrf.mxu1 }
 0x168   : >> { %v590_v48 = vadd.f32 %v544_v62, %v424_v40 }
 0x169   : >> { %v546_v1 = vpop.f32.mrf.mxu0  ;;  %v586_v2 = vpop.f32.mrf.mxu1 }
 0x16b   : >> { %v547_v3 = vpop.f32.mrf.mxu0  ;;  %v2566_v4 = vpop.f32.mrf.mxu1 }
 0x16d   : >> { %v666_v5 = vpop.f32.mrf.mxu0  ;;  %v707_v6 = vpop.f32.mrf.mxu1 }
 0x16e   : >> { %v713_v49 = vadd.f32 %v666_v5, %v589_v41  ;;  %v715_v50 = vadd.f32 %v707_v6, %v591_v42 }
 0x16f   : >> { %v668_v7 = vpop.f32.mrf.mxu0  ;;  %v2571_v8 = vpop.f32.mrf.mxu1 }
 0x170   : >> { %v714_v57 = vadd.f32 %v668_v7, %v590_v48  ;;  %v1285_v7 = vpop.permute.xlu0 %1284 }
 0x171   : >> { %v670_v9 = vpop.f32.mrf.mxu0  ;;  %v710_v10 = vpop.f32.mrf.mxu1 }
 0x172   : >> { %v1304_v9 = vsub.s32 2, %v1295_v52 }
 0x173   : >> { %v671_v14 = vpop.f32.mrf.mxu0  ;;  %v2572_v15 = vpop.f32.mrf.mxu1 }
 0x174   : >> { %v1296_v15 = vsub.s32 0, %v1295_v52 }
 0x175   : >> { %v768_v16 = vpop.f32.mrf.mxu0  ;;  %v809_v17 = vpop.f32.mrf.mxu1 }
 0x176   : >> { %v815_v59 = vadd.f32 %v768_v16, %v713_v49  ;;  %v817_v63 = vadd.f32 %v809_v17, %v715_v50 }
 0x177   : >> { %v770_v18 = vpop.f32.mrf.mxu0  ;;  %v2577_v19 = vpop.f32.mrf.mxu1 }
 0x178   : >> { %v816_v43 = vadd.f32 %v770_v18, %v714_v57  ;;  %v1300_v19 = vsub.s32 1, %v1295_v52 }
 0x179   : >> { %v772_v20 = vpop.f32.mrf.mxu0  ;;  %v812_v21 = vpop.f32.mrf.mxu1 }
 0x17b   : >> { %v773_v22 = vpop.f32.mrf.mxu0  ;;  %v2578_v23 = vpop.f32.mrf.mxu1 }
 0x17c   : >> { %v2951_v22 = vrot.slane %v2755_v0, %v1304_v9 }
 0x17d   : >> { %v884_v24 = vpop.f32.mrf.mxu0  ;;  %v925_v25 = vpop.f32.mrf.mxu1 }
 0x17e   : >> { %v931_v44 = vadd.f32 %v884_v24, %v815_v59  ;;  %v933_v51 = vadd.f32 %v925_v25, %v817_v63 }
 0x17f   : >> { %v886_v26 = vpop.f32.mrf.mxu0  ;;  %v2583_v27 = vpop.f32.mrf.mxu1 }
 0x180   : >> { %v932_v60 = vadd.f32 %v886_v26, %v816_v43  ;;  %v2954_v26 = vrot.slane %v2755_v0, %v1296_v15 }
 0x181   : >> { %v888_v28 = vpop.f32.mrf.mxu0  ;;  %v928_v29 = vpop.f32.mrf.mxu1 }
 0x183   : >> { %v889_v30 = vpop.f32.mrf.mxu0  ;;  %v2584_v31 = vpop.f32.mrf.mxu1 }
 0x185   : >> { %v1000_v32 = vpop.f32.mrf.mxu0  ;;  %v1041_v33 = vpop.f32.mrf.mxu1 }
 0x186   : >> { %v1047_v61 = vadd.f32 %v1000_v32, %v931_v44  ;;  %v1049_v3 = vadd.f32 %v1041_v33, %v933_v51  ;;  %v2957_v32 = vrot.slane %v2755_v0, %v1300_v19  ;;  %v237_v44 = vld [vmem:[%s2825_s13 + $0x4] sm:$0xf] }
 0x187   : >> { %v1002_v34 = vpop.f32.mrf.mxu0  ;;  %v2589_v35 = vpop.f32.mrf.mxu1 }
 0x188   : >> { %v1048_v5 = vadd.f32 %v1002_v34, %v932_v60 }
 0x189   : >> { %v1004_v38 = vpop.f32.mrf.mxu0  ;;  %v1044_v39 = vpop.f32.mrf.mxu1 }
 0x18b   : >> { %v1005_v46 = vpop.f32.mrf.mxu0  ;;  %v2590_v47 = vpop.f32.mrf.mxu1 }
 0x18d   : >> { %v1116_v55 = vpop.f32.mrf.mxu0  ;;  %v1157_v56 = vpop.f32.mrf.mxu1 }
 0x18e   : >> { %v1163_v6 = vadd.f32 %v1116_v55, %v1047_v61  ;;  %v1165_v8 = vadd.f32 %v1157_v56, %v1049_v3 }
 0x18f   : >> { %v1118_v1 = vpop.f32.mrf.mxu0  ;;  %v2595_v2 = vpop.f32.mrf.mxu1 }
 0x190   : >> { %v1164_v16 = vadd.f32 %v1118_v1, %v1048_v5  ;;  %v226_v5 = vld [vmem:[%s2832_s18 + $0x14] sm:$0x3] }
 0x191   : >> { %v1120_v45 = vpop.f32.mrf.mxu0  ;;  %v1160_v53 = vpop.f32.mrf.mxu1 }
 0x193   : >> { %v1121_v62 = vpop.f32.mrf.mxu0  ;;  %v2596_v4 = vpop.f32.mrf.mxu1 }
 0x195   : >> { %v1232_v10 = vpop.f32.mrf.mxu0  ;;  %v1273_v14 = vpop.f32.mrf.mxu1 }
 0x196   : >> { %v1279_v17 = vadd.f32 %v1232_v10, %v1163_v6  ;;  %v1281_v18 = vadd.f32 %v1273_v14, %v1165_v8 }
 0x197   : >> { %v1234_v20 = vpop.f32.mrf.mxu0  ;;  %v2601_v21 = vpop.f32.mrf.mxu1 }
 0x198   : >> { %v1287_v23 = vadd.f32 %v1285_v7, %v1279_v17  ;;  %v1289_v24 = vadd.f32 %v1285_v7, %v1281_v18  ;;  %v1280_v25 = vadd.f32 %v1234_v20, %v1164_v16  ;;  %v225_v18 = vld [vmem:[%s2832_s18 + $0x12] sm:$0x3] }
 0x199   : >> { %v1236_v27 = vpop.f32.mrf.mxu0  ;;  %v1276_v28 = vpop.f32.mrf.mxu1 }
 0x19a   : >> { %v1290_v29 = vmax.f32 %v1287_v23, 0.0  ;;  %v1292_v30 = vmax.f32 %v1289_v24, 0.0  ;;  %v1288_v31 = vadd.f32 %v1285_v7, %v1280_v25 }
 0x19b   : >> { %v1237_v33 = vpop.f32.mrf.mxu0  ;;  %v2602_v34 = vpop.f32.mrf.mxu1 }
 0x19c   : >> { %v1311_v35 = vmul.f32 %v2951_v22, %v1292_v30  ;;  %v1291_v36 = vmax.f32 %v1288_v31, 0.0  ;;  %v1309_v37 = vmul.f32 %v2954_v26, %v1290_v29  ;;  %v227_v30 = vld [vmem:[%s2832_s18 + $0x16] sm:$0x3] }
 0x19e   : >> { %v1310_v38 = vmul.f32 %v2957_v32, %v1291_v36  ;;  %1318 = vst.msk [vmem:[#allocation2 + $0xc] sm:$0xf] %vm1317_vm14, %v1311_v35 }
 0x1a0   : >> { %v1314_v39 = vcombine.low %v1309_v37, %v1310_v38  ;;  %v2691_v57 = vcombine.low %v1310_v38, %v1310_v38 }
 0x1a2   : >> { %1316 = vst [vmem:[#allocation2 + $0x4] sm:$0xff] %v1314_v39  ;;  %v2977_v54 = vpack.c.bf16 %v1314_v39, %v1314_v39  ;;  %v2984_v59 = vpack.c.bf16 %v2691_v57, %v2691_v57 }
 0x1a5   : >> { %v1894_v55 = vld [vmem:[#allocation2 + $0xc] sm:$0xf] }
 0x1a6   : >> { %v1900_v56 = vpack.c.bf16 %v1894_v55, %v1894_v55  ;;  %v2124_v63 = vld [vmem:[#allocation2 + $0xc] sm:$0xf] }
 0x1a7   : >> { %v2009_v1 = vld [vmem:[#allocation2 + $0xc] sm:$0xf]  ;;  %v2130_v2 = vpack.c.bf16 %v2124_v63, %v2124_v63 }
 0x1a8   : >> { %v2015_v43 = vpack.c.bf16 %v2009_v1, %v2009_v1  ;;  %v2239_v51 = vld [vmem:[#allocation2 + $0xc] sm:$0xf] }
 0x1a9   : >> { %v1320_v40 = vld [vmem:[#allocation2 + $0x8] sm:$0xff]  ;;  %v1319_v41 = vld [vmem:[#allocation2] sm:$0xff]  ;;  %v2245_v52 = vpack.c.bf16 %v2239_v51, %v2239_v51 }
 0x1aa   : >> { %v1329_v42 = vpack.c.bf16 %v1320_v40, %v1320_v40  ;;  %v1327_v46 = vpack.c.bf16 %v1319_v41, %v1319_v41  ;;  %v1323_v47 = vcombine.high %v1319_v41, %v1319_v41  ;;  %v1324_v49 = vcombine.high %v1320_v40, %v1320_v40  ;;  %v228_v41 = vld [vmem:[%s2832_s18 + $0x18] sm:$0x3] }
 0x1ac   : >> { %1339 = vrot.lane.b32.xlu0 %v1329_v42, %s2708_s28  ;;  %1335 = vrot.lane.b32.xlu1 %v1327_v46, %s2708_s28  ;;  %v1328_v48 = vpack.c.bf16 %v1323_v47, %v1323_v47  ;;  %v1330_v50 = vpack.c.bf16 %v1324_v49, %v1324_v49 }
 0x1b0   : >> { %1439 = vrot.lane.b32.xlu0 %v1327_v46, %s2712_s29  ;;  %1337 = vrot.lane.b32.xlu1 %v1328_v48, %s2708_s28 }
 0x1b4   : >> { %1443 = vrot.lane.b32.xlu0 %v1329_v42, %s2712_s29  ;;  %1341 = vrot.lane.b32.xlu1 %v1330_v50, %s2708_s28 }
 0x1b8   : >> { %1559 = vrot.lane.b32.xlu0 %v1327_v46, %s2713_s30  ;;  %1441 = vrot.lane.b32.xlu1 %v1328_v48, %s2712_s29 }
 0x1bc   : >> { %1563 = vrot.lane.b32.xlu0 %v1329_v42, %s2713_s30  ;;  %1445 = vrot.lane.b32.xlu1 %v1330_v50, %s2712_s29 }
 0x1c0   : >> { %1682 = vrot.lane.b32.xlu0 %v1327_v46, %s2714_s5  ;;  %1561 = vrot.lane.b32.xlu1 %v1328_v48, %s2713_s30 }
 0x1c4   : >> { %1686 = vrot.lane.b32.xlu0 %v1329_v42, %s2714_s5  ;;  %1565 = vrot.lane.b32.xlu1 %v1330_v50, %s2713_s30  ;;  %v1790_v42 = vld [vmem:[#allocation2 + $0xc] sm:$0xf] }
 0x1c5   : >> { %v1796_v55 = vpack.c.bf16 %v1790_v42, %v1790_v42 }
 0x1c7   : >> { %v1807_v63 = vsel %vm272_vm5, %v1796_v55, 0 }
 0x1c8   : >> { %1904 = vrot.lane.b32.xlu0 %v2977_v54, %s2715_s6  ;;  %1684 = vrot.lane.b32.xlu1 %v1328_v48, %s2714_s5 }
 0x1cc   : >> { %1908 = vrot.lane.b32.xlu0 %v1900_v56, %s2715_s6  ;;  %1688 = vrot.lane.b32.xlu1 %v1330_v50, %s2714_s5  ;;  %v1801_v50 = vsel %vm272_vm5, %v2977_v54, 0 }
 0x1d0   : >> { %2021 = vrot.lane.b32.xlu0 %v2984_v59, %s2716_s7  ;;  %1906 = vrot.lane.b32.xlu1 %v2984_v59, %s2715_s6 }
 0x1d4   : >> { %2134 = vrot.lane.b32.xlu0 %v2977_v54, %s2717_s8  ;;  %2019 = vrot.lane.b32.xlu1 %v2977_v54, %s2716_s7 }
 0x1d8   : >> { %2138 = vrot.lane.b32.xlu0 %v2130_v2, %s2717_s8  ;;  %2023 = vrot.lane.b32.xlu1 %v2015_v43, %s2716_s7 }
 0x1dc   : >> { %2251 = vrot.lane.b32.xlu0 %v2984_v59, %s2718_s9  ;;  %2136 = vrot.lane.b32.xlu1 %v2984_v59, %s2717_s8 }
 0x1e0   : >> { %2355 = vperm.xlu0 %2685, %v237_v44   ;;  %2249 = vrot.lane.b32.xlu1 %v2977_v54, %s2718_s9  ;;  %v229_v54 = vld [vmem:[%s2832_s18 + $0x1a] sm:$0x3] }
 0x1e4   : >> { %2253 = vrot.lane.b32.xlu1 %v2245_v52, %s2718_s9 }
 0x21e   : >> { %v1340_v45 = vpop.permute.xlu0 %1339  ;;  %v1336_v53 = vpop.permute.xlu1 %1335 }
 0x222   : >> { %v1440_v60 = vpop.permute.xlu0 %1439  ;;  %v1338_v61 = vpop.permute.xlu1 %1337 }
 0x223   : >> { %v1343_v3 = vsel %vm264_vm4, %v1336_v53, %v1338_v61  ;;  %v1344_v62 = vsel %vm264_vm4, %v1338_v61, %v1340_v45 }
 0x224   : >> { %v1350_v4 = vsel %vm272_vm5, %v1343_v3, 0  ;;  %2482 = vmatprep.subr.msk.bf16.mxu0 %vm272_vm5, %v1344_v62 }
 0x225   : >> { %1373 = vmatpush1.bf16.msra.mxu0 %v1350_v4 }
 0x226   : >> { %v1444_v6 = vpop.permute.xlu0 %1443  ;;  %v1342_v8 = vpop.permute.xlu1 %1341 }
 0x227   : >> { %v1345_v9 = vsel %vm264_vm4, %v1340_v45, %v1342_v8 }
 0x228   : >> { %v1356_v7 = vsel %vm272_vm5, %v1345_v9, 0  ;;  %2483 = vmatmul.mubr.msk.bf16.vlgmr.msra.gmra.mxu0 %vm268_vm6, %v226_v5  ;;  %v231_v9 = vld [vmem:[%s2832_s18 + $0x1e] sm:$0x3] }
 0x229   : >> { %2604 = vmatpush3.bf16.msra.mxu1 %v1356_v7  ;;  %1494 = vmatprep.mubr.bf16.mxu0 %v2710_v12 }
 0x22a   : >> { %v1560_v10 = vpop.permute.xlu0 %1559  ;;  %v1442_v14 = vpop.permute.xlu1 %1441  ;;  %2609 = vmatprep.subr.bf16.mxu1 %v2709_v11 }
 0x22b   : >> { %v1447_v15 = vsel %vm371_vm7, %v1440_v60, %v1442_v14  ;;  %v1448_v16 = vsel %vm371_vm7, %v1442_v14, %v1444_v6  ;;  %v230_v60 = vld [vmem:[%s2832_s18 + $0x1c] sm:$0x3] }
 0x22c   : >> { %v1454_v17 = vsel %vm272_vm5, %v1447_v15, 0  ;;  %2606 = vmatmul.mubr.msk.bf16.vlgmr.msra.gmra.mxu1 %vm268_vm6, %v226_v5  ;;  %2485 = vmatprep.subr.msk.bf16.mxu0 %vm272_vm5, %v1448_v16 }
 0x22d   : >> { %1477 = vmatpush1.bf16.msra.mxu0 %v1454_v17  ;;  %2611 = vmatprep.mubr.msk.bf16.mxu1 %vm2711_vm3, %v2709_v11 }
 0x22e   : >> { %v1564_v19 = vpop.permute.xlu0 %1563  ;;  %v1446_v20 = vpop.permute.xlu1 %1445 }
 0x22f   : >> { %v1449_v21 = vsel %vm371_vm7, %v1444_v6, %v1446_v20 }
 0x230   : >> { %v1460_v23 = vsel %vm272_vm5, %v1449_v21, 0  ;;  %2486 = vmatmul.mubr.msk.bf16.vlgmr.msra.gmra.mxu0 %vm268_vm6, %v225_v18  ;;  %v233_v21 = vld [vmem:[%s2832_s18 + $0x22] sm:$0x3] }
 0x231   : >> { %2610 = vmatpush3.bf16.msra.mxu1 %v1460_v23  ;;  %1614 = vmatprep.mubr.bf16.mxu0 %v2710_v12 }
 0x232   : >> { %v1683_v24 = vpop.permute.xlu0 %1682  ;;  %v1562_v25 = vpop.permute.xlu1 %1561  ;;  %2615 = vmatprep.subr.bf16.mxu1 %v2709_v11 }
 0x233   : >> { %v1567_v27 = vsel %vm492_vm8, %v1560_v10, %v1562_v25  ;;  %v1568_v28 = vsel %vm492_vm8, %v1562_v25, %v1564_v19 }
 0x234   : >> { %v1574_v29 = vsel %vm272_vm5, %v1567_v27, 0  ;;  %2612 = vmatmul.mubr.msk.bf16.vlgmr.msra.gmra.mxu1 %vm268_vm6, %v225_v18  ;;  %2488 = vmatprep.subr.msk.bf16.mxu0 %vm272_vm5, %v1568_v28  ;;  %v232_v18 = vld [vmem:[%s2832_s18 + $0x20] sm:$0x3] }
 0x235   : >> { %1597 = vmatpush1.bf16.msra.mxu0 %v1574_v29  ;;  %2617 = vmatprep.mubr.msk.bf16.mxu1 %vm2711_vm3, %v2709_v11 }
 0x236   : >> { %v1687_v31 = vpop.permute.xlu0 %1686  ;;  %v1566_v33 = vpop.permute.xlu1 %1565 }
 0x237   : >> { %v1569_v34 = vsel %vm492_vm8, %v1564_v19, %v1566_v33 }
 0x238   : >> { %v1580_v35 = vsel %vm272_vm5, %v1569_v34, 0  ;;  %2489 = vmatmul.mubr.msk.bf16.vlgmr.msra.gmra.mxu0 %vm268_vm6, %v227_v30 }
 0x239   : >> { %2616 = vmatpush3.bf16.msra.mxu1 %v1580_v35  ;;  %1737 = vmatprep.mubr.bf16.mxu0 %v2710_v12 }
 0x23a   : >> { %v1905_v36 = vpop.permute.xlu0 %1904  ;;  %v1685_v37 = vpop.permute.xlu1 %1684  ;;  %2621 = vmatprep.subr.bf16.mxu1 %v2709_v11 }
 0x23b   : >> { %v1690_v38 = vsel %vm616_vm9, %v1683_v24, %v1685_v37  ;;  %v1691_v39 = vsel %vm616_vm9, %v1685_v37, %v1687_v31 }
 0x23c   : >> { %v1697_v40 = vsel %vm272_vm5, %v1690_v38, 0  ;;  %2618 = vmatmul.mubr.msk.bf16.vlgmr.msra.gmra.mxu1 %vm268_vm6, %v227_v30  ;;  %2491 = vmatprep.subr.msk.bf16.mxu0 %vm272_vm5, %v1691_v39 }
 0x23d   : >> { %1720 = vmatpush1.bf16.msra.mxu0 %v1697_v40  ;;  %2623 = vmatprep.mubr.msk.bf16.mxu1 %vm2711_vm3, %v2709_v11 }
 0x23e   : >> { %v1909_v46 = vpop.permute.xlu0 %1908  ;;  %2494 = vmatprep.subr.msk.bf16.mxu0 %vm272_vm5, %v2984_v59  ;;  %v1689_v47 = vpop.permute.xlu1 %1688 }
 0x23f   : >> { %v1692_v48 = vsel %vm616_vm9, %v1687_v31, %v1689_v47  ;;  %v1922_v45 = vsel %vm272_vm5, %v1909_v46, 0 }
 0x240   : >> { %v1703_v49 = vsel %vm272_vm5, %v1692_v48, 0  ;;  %2492 = vmatmul.mubr.msk.bf16.vlgmr.msra.gmra.mxu0 %vm268_vm6, %v228_v41 }
 0x241   : >> { %2622 = vmatpush3.bf16.msra.mxu1 %v1703_v49  ;;  %1824 = vmatpush1.bf16.msra.mxu0 %v1801_v50 }
 0x242   : >> { %v2022_v56 = vpop.permute.xlu0 %2021  ;;  %v1907_v57 = vpop.permute.xlu1 %1906  ;;  %2627 = vmatprep.subr.bf16.mxu1 %v2709_v11  ;;  %1841 = vmatprep.mubr.bf16.mxu0 %v2710_v12 }
 0x243   : >> { %v1911_v59 = vsel %vm835_vm10, %v1907_v57, %v1909_v46  ;;  %v1910_v1 = vsel %vm835_vm10, %v1905_v36, %v1907_v57 }
 0x244   : >> { %2624 = vmatmul.mubr.msk.bf16.vlgmr.msra.gmra.mxu1 %vm268_vm6, %v228_v41  ;;  %2497 = vmatprep.subr.msk.bf16.mxu0 %vm272_vm5, %v1911_v59  ;;  %v1916_v43 = vsel %vm272_vm5, %v1910_v1, 0 }
 0x245   : >> { %2628 = vmatpush3.bf16.msra.mxu1 %v1807_v63  ;;  %2629 = vmatprep.mubr.msk.bf16.mxu1 %vm2711_vm3, %v2709_v11 }
 0x246   : >> { %v2020_v2 = vpop.permute.xlu1 %2019  ;;  %2633 = vmatprep.subr.bf16.mxu1 %v2709_v11  ;;  %v2135_v44 = vpop.permute.xlu0 %2134 }
 0x247   : >> { %v2025_v53 = vsel %vm951_vm11, %v2020_v2, %v2022_v56 }
 0x248   : >> { %2495 = vmatmul.mubr.msk.bf16.vlgmr.msra.gmra.mxu0 %vm268_vm6, %v229_v54  ;;  %v2031_v4 = vsel %vm272_vm5, %v2025_v53, 0 }
 0x249   : >> { %1939 = vmatpush1.bf16.msra.mxu0 %v1916_v43  ;;  %1956 = vmatprep.mubr.bf16.mxu0 %v2710_v12 }
 0x24a   : >> { %v2024_v51 = vpop.permute.xlu1 %2023  ;;  %v2139_v61 = vpop.permute.xlu0 %2138 }
 0x24b   : >> { %v2026_v52 = vsel %vm951_vm11, %v2022_v56, %v2024_v51  ;;  %v2037_v6 = vsel %vm272_vm5, %v2024_v51, 0  ;;  %v2152_v16 = vsel %vm272_vm5, %v2139_v61, 0 }
 0x24c   : >> { %2630 = vmatmul.mubr.msk.bf16.vlgmr.msra.gmra.mxu1 %vm268_vm6, %v229_v54  ;;  %2500 = vmatprep.subr.msk.bf16.mxu0 %vm272_vm5, %v2026_v52 }
 0x24d   : >> { %2634 = vmatpush3.bf16.msra.mxu1 %v1922_v45  ;;  %2635 = vmatprep.mubr.msk.bf16.mxu1 %vm2711_vm3, %v2709_v11 }
 0x24e   : >> { %v2137_v3 = vpop.permute.xlu1 %2136  ;;  %2639 = vmatprep.subr.bf16.mxu1 %v2709_v11  ;;  %v2252_v7 = vpop.permute.xlu0 %2251 }
 0x24f   : >> { %v2141_v62 = vsel %vm1067_vm12, %v2137_v3, %v2139_v61  ;;  %v2140_v8 = vsel %vm1067_vm12, %v2135_v44, %v2137_v3 }
 0x250   : >> { %2498 = vmatmul.mubr.msk.bf16.vlgmr.msra.gmra.mxu0 %vm268_vm6, %v230_v60  ;;  %v2146_v15 = vsel %vm272_vm5, %v2140_v8, 0 }
 0x251   : >> { %2054 = vmatpush1.bf16.msra.mxu0 %v2031_v4  ;;  %2071 = vmatprep.mubr.bf16.mxu0 %v2710_v12 }
 0x252   : >> { %2503 = vmatprep.subr.msk.bf16.mxu0 %vm272_vm5, %v2141_v62  ;;  %v2250_v5 = vpop.permute.xlu1 %2249 }
 0x253   : >> { %v2255_v17 = vsel %vm1183_vm13, %v2250_v5, %v2252_v7 }
 0x254   : >> { %2636 = vmatmul.mubr.msk.bf16.vlgmr.msra.gmra.mxu1 %vm268_vm6, %v230_v60  ;;  %v2261_v19 = vsel %vm272_vm5, %v2255_v17, 0 }
 0x255   : >> { %2640 = vmatpush3.bf16.msra.mxu1 %v2037_v6  ;;  %2641 = vmatprep.mubr.msk.bf16.mxu1 %vm2711_vm3, %v2709_v11 }
 0x256   : >> { %v2254_v10 = vpop.permute.xlu1 %2253  ;;  %2645 = vmatprep.subr.bf16.mxu1 %v2709_v11 }
 0x257   : >> { %v2256_v14 = vsel %vm1183_vm13, %v2252_v7, %v2254_v10  ;;  %v2267_v20 = vsel %vm272_vm5, %v2254_v10, 0 }
 0x258   : >> { %2501 = vmatmul.mubr.msk.bf16.vlgmr.msra.gmra.mxu0 %vm268_vm6, %v231_v9 }
 0x259   : >> { %2169 = vmatpush1.bf16.msra.mxu0 %v2146_v15  ;;  %2186 = vmatprep.mubr.bf16.mxu0 %v2710_v12 }
 0x25a   : >> { %2506 = vmatprep.subr.msk.bf16.mxu0 %vm272_vm5, %v2256_v14 }
 0x25c   : >> { %2642 = vmatmul.mubr.msk.bf16.vlgmr.msra.gmra.mxu1 %vm268_vm6, %v231_v9 }
 0x25d   : >> { %2646 = vmatpush3.bf16.msra.mxu1 %v2152_v16  ;;  %2647 = vmatprep.mubr.msk.bf16.mxu1 %vm2711_vm3, %v2709_v11 }
 0x25e   : >> { %2651 = vmatprep.subr.bf16.mxu1 %v2709_v11 }
 0x260   : >> { %2504 = vmatmul.mubr.msk.bf16.vlgmr.msra.gmra.mxu0 %vm268_vm6, %v232_v18 }
 0x261   : >> { %2284 = vmatpush1.bf16.msra.mxu0 %v2261_v19  ;;  %2301 = vmatprep.mubr.bf16.mxu0 %v2710_v12 }
 0x264   : >> { %2648 = vmatmul.mubr.msk.bf16.vlgmr.msra.gmra.mxu1 %vm268_vm6, %v232_v18 }
 0x265   : >> { %2652 = vmatpush3.bf16.msra.mxu1 %v2267_v20  ;;  %2653 = vmatprep.mubr.msk.bf16.mxu1 %vm2711_vm3, %v2709_v11 }
 0x268   : >> { %2507 = vmatmul.mubr.msk.bf16.vlgmr.msra.gmra.mxu0 %vm268_vm6, %v233_v21 }
 0x26c   : >> { %2654 = vmatmul.mubr.msk.bf16.vlgmr.msra.gmra.mxu1 %vm268_vm6, %v233_v21 }
 0x2e8   : >> { %v1392_v23 = vpop.f32.mrf.mxu0 }
 0x2ea   : >> { %v1394_v24 = vpop.f32.mrf.mxu0 }
 0x2ec   : >> { %v1396_v25 = vpop.f32.mrf.mxu0  ;;  %v1433_v27 = vpop.f32.mrf.mxu1 }
 0x2ee   : >> { %v1397_v28 = vpop.f32.mrf.mxu0  ;;  %v2607_v29 = vpop.f32.mrf.mxu1 }
 0x2f0   : >> { %v1436_v12 = vpop.f32.mrf.mxu1  ;;  %v1496_v30 = vpop.f32.mrf.mxu0 }
 0x2f1   : >> { %v1497_v14 = vadd.f32 %v1496_v30, %v1392_v23 }
 0x2f2   : >> { %v2608_v31 = vpop.f32.mrf.mxu1  ;;  %v1498_v33 = vpop.f32.mrf.mxu0 }
 0x2f3   : >> { %v1499_v17 = vadd.f32 %v1498_v33, %v1394_v24 }
 0x2f4   : >> { %v1500_v34 = vpop.f32.mrf.mxu0  ;;  %v1537_v35 = vpop.f32.mrf.mxu1 }
 0x2f5   : >> { %v1538_v21 = vadd.f32 %v1537_v35, %v1433_v27 }
 0x2f6   : >> { %v1501_v36 = vpop.f32.mrf.mxu0  ;;  %v2613_v37 = vpop.f32.mrf.mxu1 }
 0x2f8   : >> { %v1540_v38 = vpop.f32.mrf.mxu1  ;;  %v1616_v11 = vpop.f32.mrf.mxu0 }
 0x2f9   : >> { %v1663_v18 = vadd.f32 %v1616_v11, %v1497_v14 }
 0x2fa   : >> { %v2614_v39 = vpop.f32.mrf.mxu1  ;;  %v1618_v40 = vpop.f32.mrf.mxu0 }
 0x2fb   : >> { %v1664_v25 = vadd.f32 %v1618_v40, %v1499_v17 }
 0x2fc   : >> { %v1620_v41 = vpop.f32.mrf.mxu0  ;;  %v1657_v42 = vpop.f32.mrf.mxu1 }
 0x2fd   : >> { %v1665_v31 = vadd.f32 %v1657_v42, %v1538_v21  ;;  %v2356_v42 = vpop.permute.xlu0 %2355 }
 0x2fe   : >> { %v1621_v46 = vpop.f32.mrf.mxu0  ;;  %v2619_v47 = vpop.f32.mrf.mxu1 }
 0x300   : >> { %v1660_v48 = vpop.f32.mrf.mxu1  ;;  %v1739_v49 = vpop.f32.mrf.mxu0 }
 0x301   : >> { %v1786_v28 = vadd.f32 %v1739_v49, %v1663_v18 }
 0x302   : >> { %v2620_v50 = vpop.f32.mrf.mxu1  ;;  %v1741_v55 = vpop.f32.mrf.mxu0 }
 0x303   : >> { %v1787_v34 = vadd.f32 %v1741_v55, %v1664_v25 }
 0x304   : >> { %v1743_v56 = vpop.f32.mrf.mxu0  ;;  %v1780_v57 = vpop.f32.mrf.mxu1 }
 0x305   : >> { %v1788_v39 = vadd.f32 %v1780_v57, %v1665_v31 }
 0x306   : >> { %v1744_v59 = vpop.f32.mrf.mxu0  ;;  %v2625_v63 = vpop.f32.mrf.mxu1 }
 0x308   : >> { %v1783_v1 = vpop.f32.mrf.mxu1  ;;  %v1843_v54 = vpop.f32.mrf.mxu0 }
 0x309   : >> { %v1890_v36 = vadd.f32 %v1843_v54, %v1786_v28 }
 0x30a   : >> { %v2626_v2 = vpop.f32.mrf.mxu1  ;;  %v1845_v43 = vpop.f32.mrf.mxu0 }
 0x30b   : >> { %v1891_v41 = vadd.f32 %v1845_v43, %v1787_v34 }
 0x30c   : >> { %v1847_v44 = vpop.f32.mrf.mxu0  ;;  %v1884_v51 = vpop.f32.mrf.mxu1 }
 0x30d   : >> { %v1892_v47 = vadd.f32 %v1884_v51, %v1788_v39 }
 0x30e   : >> { %v1848_v52 = vpop.f32.mrf.mxu0  ;;  %v2631_v45 = vpop.f32.mrf.mxu1 }
 0x310   : >> { %v1887_v53 = vpop.f32.mrf.mxu1  ;;  %v1958_v60 = vpop.f32.mrf.mxu0 }
 0x311   : >> { %v2005_v46 = vadd.f32 %v1958_v60, %v1890_v36 }
 0x312   : >> { %v2632_v61 = vpop.f32.mrf.mxu1  ;;  %v1960_v3 = vpop.f32.mrf.mxu0 }
 0x313   : >> { %v2006_v24 = vadd.f32 %v1960_v3, %v1891_v41 }
 0x314   : >> { %v1962_v62 = vpop.f32.mrf.mxu0  ;;  %v1999_v4 = vpop.f32.mrf.mxu1 }
 0x315   : >> { %v2007_v27 = vadd.f32 %v1999_v4, %v1892_v47  ;;  %v2370_v4 = vcombine.low %v2954_v26, %v2957_v32 }
 0x316   : >> { %v1963_v5 = vpop.f32.mrf.mxu0  ;;  %v2637_v6 = vpop.f32.mrf.mxu1 }
 0x318   : >> { %v2002_v8 = vpop.f32.mrf.mxu1  ;;  %v2073_v9 = vpop.f32.mrf.mxu0 }
 0x319   : >> { %v2120_v33 = vadd.f32 %v2073_v9, %v2005_v46 }
 0x31a   : >> { %v2638_v7 = vpop.f32.mrf.mxu1  ;;  %v2075_v10 = vpop.f32.mrf.mxu0 }
 0x31b   : >> { %v2121_v35 = vadd.f32 %v2075_v10, %v2006_v24 }
 0x31c   : >> { %v2077_v15 = vpop.f32.mrf.mxu0  ;;  %v2114_v16 = vpop.f32.mrf.mxu1 }
 0x31d   : >> { %v2122_v55 = vadd.f32 %v2114_v16, %v2007_v27 }
 0x31e   : >> { %v2078_v19 = vpop.f32.mrf.mxu0  ;;  %v2643_v20 = vpop.f32.mrf.mxu1 }
 0x320   : >> { %v2117_v29 = vpop.f32.mrf.mxu1  ;;  %v2188_v12 = vpop.f32.mrf.mxu0 }
 0x321   : >> { %v2235_v40 = vadd.f32 %v2188_v12, %v2120_v33 }
 0x322   : >> { %v2644_v37 = vpop.f32.mrf.mxu1  ;;  %v2190_v38 = vpop.f32.mrf.mxu0 }
 0x323   : >> { %v2236_v56 = vadd.f32 %v2190_v38, %v2121_v35 }
 0x324   : >> { %v2192_v23 = vpop.f32.mrf.mxu0  ;;  %v2229_v30 = vpop.f32.mrf.mxu1 }
 0x325   : >> { %v2237_v1 = vadd.f32 %v2229_v30, %v2122_v55 }
 0x326   : >> { %v2193_v11 = vpop.f32.mrf.mxu0  ;;  %v2649_v48 = vpop.f32.mrf.mxu1 }
 0x328   : >> { %v2232_v49 = vpop.f32.mrf.mxu1  ;;  %v2303_v50 = vpop.f32.mrf.mxu0 }
 0x329   : >> { %v2350_v59 = vadd.f32 %v2303_v50, %v2235_v40 }
 0x32a   : >> { %v2650_v63 = vpop.f32.mrf.mxu1  ;;  %v2305_v57 = vpop.f32.mrf.mxu0 }
 0x32b   : >> { %v2358_v54 = vadd.f32 %v2356_v42, %v2350_v59  ;;  %v2351_v2 = vadd.f32 %v2305_v57, %v2236_v56 }
 0x32c   : >> { %v2307_v43 = vpop.f32.mrf.mxu0  ;;  %v2344_v44 = vpop.f32.mrf.mxu1 }
 0x32d   : >> { %v2359_v51 = vadd.f32 %v2356_v42, %v2351_v2  ;;  %v2352_v52 = vadd.f32 %v2344_v44, %v2237_v1  ;;  %v2361_v60 = vmax.f32 %v2358_v54, 0.0 }
 0x32e   : >> { %v2308_v45 = vpop.f32.mrf.mxu0  ;;  %v2655_v53 = vpop.f32.mrf.mxu1 }
 0x32f   : >> { %v2362_v61 = vmax.f32 %v2359_v51, 0.0  ;;  %v2360_v3 = vadd.f32 %v2356_v42, %v2352_v52 }
 0x330   : >> { %v2347_v62 = vpop.f32.mrf.mxu1 }
 0x331   : >> { %v2366_v5 = vcombine.low %v2361_v60, %v2362_v61  ;;  %v2363_v6 = vmax.f32 %v2360_v3, 0.0 }
 0x332   : >> { %v2656_v8 = vpop.f32.mrf.mxu1 }
 0x333   : >> { %v2368_v9 = vadd.f32 %v2366_v5, %v2787_v13  ;;  %v2369_v7 = vadd.f32 %v2363_v6, %v2868_v58  ;;  %211 = sbr.rel (!%p209_p4) target bundleno = 16 (0x10), region = 75 }
 0x335   : >> { %v2372_v10 = vmul.f32 %v2370_v4, %v2368_v9  ;;  %v2373_v14 = vmul.f32 %v2369_v7, %v2951_v22 }
 0x337   : >> { %2374 = vst [vmem:[#allocation2 + $0x4] sm:$0xff] %v2372_v10  ;;  %2375 = vst.msk [vmem:[#allocation2 + $0xc] sm:$0xf] %vm1317_vm14, %v2373_v14 }
 0x33e   : > { %v2376_v26 = vld [vmem:[#allocation2 + $0x4] sm:$0xff]  ;;  %v2377_v32 = vld [vmem:[#allocation2 + $0xc] sm:$0xf] }
 0x33f   : > { %2378 = vst [vmem:[%s2763_s26] sm:$0xff] %v2376_v26  ;;  %2380 = vst.msk [vmem:[%s2763_s26 + $0x8] sm:$0xf] %vm1317_vm14, %v2377_v32 }
 0x340 PF: > { %s14_s15 = sadd.s32 1, %s2702_s15  }
 0x341   : > { %p11_p5 = scmp.ge.s32.totalorder %s14_s15, 4  }
 0x343   :  { %13 = sbr.rel (!%p11_p5) target bundleno = 1 (0x1), region = 86 }

</bundles_post_ra>
